<compile_context>
chip_gen: v7x
topology: tpu7x:2x2x1
jax: 0.10.0
libtpu: 0.0.40
codegen_flags: <defaults>
</compile_context>

<pallas_src>
import functools

import jax
import jax.numpy as jnp
import numpy as np
from jax import lax
from jax.experimental import pallas as pl
from jax.experimental.pallas import tpu as pltpu

C1, C2, C3 = 16, 32, 64      # conv channel widths from the PyTorch module
HW = 16                      # input spatial size (16x16)


# ----------------------------------------------------------------------------
# Small in-kernel helpers (value-level, no Refs)
# ----------------------------------------------------------------------------
def _shift_rows(v, offset):
    """out[r, :] = v[r + offset, :] if 0 <= r + offset < R else 0."""
    if offset == 0:
        return v
    R, N = v.shape
    z = jnp.zeros((abs(offset), N), v.dtype)
    if offset > 0:
        return jnp.concatenate([v[offset:, :], z], axis=0)
    return jnp.concatenate([z, v[:R + offset, :]], axis=0)


def _shift_lanes(v, offset):
    """out[:, l] = v[:, l + offset] (offset > 0); zeros shifted in at the end."""
    R, _ = v.shape
    z = jnp.zeros((R, offset), v.dtype)
    return jnp.concatenate([v[:, offset:], z], axis=1)


# ----------------------------------------------------------------------------
# Fused kernel
# ----------------------------------------------------------------------------
def _fused_kernel(x_ref, w1_ref, b1_ref, w2_ref, b2_ref, w3_ref, b3_ref,
                  wf_ref, bf_ref, o_ref):
    """x_ref: (1, Bc, 16, 16) f32 input chunk (channel dim squeezed).
    wN_ref: (3, K, 256) bf16 banded conv weights (one slice per kernel row dy).
    bN_ref: (1, 256) f32 channel biases tiled across column blocks.
    wf_ref: (256, E) bf16 = 4 stacked copies of (fc_weight / 16) — folds the
    column-block sum of the global average pool into the fc matmul.
    o_ref: (1, Bc, E) L2-normalized embeddings."""
    f32 = jnp.float32
    bf16 = jnp.bfloat16
    Bc = x_ref.shape[1]
    R = Bc * HW

    # Row index within each 16x16 image (images stacked along sublanes).
    row_i = lax.broadcasted_iota(jnp.int32, (R, 1), 0) % HW

    def conv_banded(lhs, w_ref, b_row, d):
        """3x3 'same' conv with row dilation d.  Column taps + column zero
        padding + column compaction live inside the banded weights; row taps
        are row shifts of the per-tap matmul results (zero pad + image mask)."""
        lhs16 = lhs.astype(bf16)
        p_top = jnp.dot(lhs16, w_ref[0], preferred_element_type=f32)  # reads row i-d
        p_ctr = jnp.dot(lhs16, w_ref[1], preferred_element_type=f32)  # reads row i
        p_bot = jnp.dot(lhs16, w_ref[2], preferred_element_type=f32)  # reads row i+d
        top = jnp.where(row_i >= d, _shift_rows(p_top, -d), 0.0)
        bot = jnp.where(row_i < HW - d, _shift_rows(p_bot, d), 0.0)
        return jnp.maximum(p_ctr + top + bot + b_row, 0.0)

    def maxpool(y, row_step, chan):
        """2x2 max pool: pairs adjacent column blocks (width `chan` lanes) and
        rows i, i+row_step.  Only the stride-(2*row_step) rows / even column
        blocks of the result are meaningful; the rest hold garbage that later
        stages never read (ReLU >= 0, banded weights zero out invalid blocks,
        GAP masks invalid rows)."""
        col = jnp.maximum(y, _shift_lanes(y, chan))
        return jnp.maximum(col, _shift_rows(col, row_step))

    # ---- conv1 + pool1 (rows dense -> valid rows stride 2) ------------------
    x2d = x_ref[...].reshape(R, HW)                         # (Bc*16, 16)
    y1 = conv_banded(x2d, w1_ref, b1_ref[...], 1)           # (R, 16*C1)
    p1 = maxpool(y1, 1, C1)

    # ---- conv2 + pool2 (rows stride 2 -> 4; columns compacted to 8 blocks) --
    y2 = conv_banded(p1, w2_ref, b2_ref[...], 2)            # (R, 8*C2)
    p2 = maxpool(y2, 2, C2)

    # ---- conv3 (rows stride 4; columns compacted to 4 blocks) ---------------
    y3 = conv_banded(p2, w3_ref, b3_ref[...], 4)            # (R, 4*C3)

    # ---- global average pool over the 16 valid positions + fc ---------------
    y3m = jnp.where(row_i % 4 == 0, y3, 0.0)                # keep valid rows
    t = jnp.sum(y3m.reshape(Bc, HW, 4 * C3), axis=1)        # (Bc, 4*C3)
    e = jnp.dot(t.astype(bf16), wf_ref[...],
                preferred_element_type=f32) + bf_ref[...]   # (Bc, E)

    # ---- L2 normalize (F.normalize eps = 1e-12) ------------------------------
    ss = jnp.sum(e * e, axis=-1, keepdims=True)
    out = e * lax.rsqrt(jnp.maximum(ss, 1e-24))
    o_ref[...] = out.reshape(o_ref.shape).astype(o_ref.dtype)


# ----------------------------------------------------------------------------
# Wrapper: banded-weight construction + pallas_call
# ----------------------------------------------------------------------------
def _band_select(n_in_blocks, in_stride, n_out_blocks, dx):
    """0/1 column-selection matrix for kernel column dx (input blocks live on a
    stride-`in_stride` lattice of the row-dilated grid; output blocks dense)."""
    a = np.zeros((n_in_blocks, n_out_blocks), np.float32)
    n_in_compact = n_in_blocks // in_stride
    for m in range(n_out_blocks):
        q = m + dx - 1
        if 0 <= q < n_in_compact:
            a[q * in_stride, m] = 1.0
    return a


def _banded_weight(w_hwio, n_in_blocks, in_stride, n_out_blocks):
    """(3, n_in_blocks*Cin, n_out_blocks*Cout): per-dy banded conv weights."""
    cin, cout = int(w_hwio.shape[2]), int(w_hwio.shape[3])
    per_dy = []
    for dy in range(3):
        acc = jnp.zeros((n_in_blocks * cin, n_out_blocks * cout), jnp.float32)
        for dx in range(3):
            sel = _band_select(n_in_blocks, in_stride, n_out_blocks, dx)
            acc = acc + jnp.kron(jnp.asarray(sel),
                                 w_hwio[dy, dx].astype(jnp.float32))
        per_dy.append(acc)
    return jnp.stack(per_dy, axis=0)


def _default_batch_chunk(B):
    if B <= 1:
        return B
    kind = ""
    try:
        kind = jax.devices()[0].device_kind.lower()
    except Exception:
        pass
    # Dual-TensorCore chips benefit from >=2 "parallel" grid steps; single-TC
    # chips (v5e / v6e) keep one step to avoid per-step pipeline overhead.
    multi_tc = ("v7" in kind) or ("7x" in kind) or ("v4" in kind) or ("v5p" in kind)
    return max(1, B // 2) if multi_tc else B


def _forward_pallas(x_nchw, params, batch_chunk=None):
    B = x_nchw.shape[0]
    assert x_nchw.shape[1:] == (1, HW, HW), x_nchw.shape
    E = params["wf"].shape[-1]

    Bc = _default_batch_chunk(B) if batch_chunk is None else batch_chunk
    assert B % Bc == 0
    nb = B // Bc

    # Squeeze the C=1 dim and split the batch into grid chunks.
    x = x_nchw.reshape(nb, Bc, HW, HW).astype(jnp.float32)

    bf16 = jnp.bfloat16
    w1 = _banded_weight(params["w1"], HW, 1, HW).astype(bf16)            # (3,16,256)
    w2 = _banded_weight(params["w2"], HW, 2, HW // 2).astype(bf16)       # (3,256,256)
    w3 = _banded_weight(params["w3"], HW // 2, 2, HW // 4).astype(bf16)  # (3,256,256)
    wf = (jnp.concatenate([params["wf"].astype(jnp.float32)] * 4, axis=0)
          / 16.0).astype(bf16)                                           # (256,E)
    b1 = jnp.tile(params["b1"].astype(jnp.float32), HW).reshape(1, HW * C1)
    b2 = jnp.tile(params["b2"].astype(jnp.float32), HW // 2).reshape(1, (HW // 2) * C2)
    b3 = jnp.tile(params["b3"].astype(jnp.float32), HW // 4).reshape(1, (HW // 4) * C3)
    bfc = params["bf"].reshape(1, E).astype(jnp.float32)

    # Advisory cost estimate (counts the MXU work actually issued).
    R = B * HW
    flops = (6 * R * (HW * HW * C1
                      + (HW * C1) * ((HW // 2) * C2)
                      + ((HW // 2) * C2) * ((HW // 4) * C3))
             + 2 * B * (4 * C3) * E)
    bytes_accessed = (4 * x.size
                      + 2 * (w1.size + w2.size + w3.size + wf.size)
                      + 4 * (b1.size + b2.size + b3.size + bfc.size)
                      + 4 * B * E)

    def _full(a):
        nd = a.ndim
        return pl.BlockSpec(a.shape, lambda i, _nd=nd: (0,) * _nd)

    out = pl.pallas_call(
        _fused_kernel,
        out_shape=jax.ShapeDtypeStruct((nb, Bc, E), jnp.float32),
        grid=(nb,),
        in_specs=[
            pl.BlockSpec((1, Bc, HW, HW), lambda i: (i, 0, 0, 0)),
            _full(w1), _full(b1),
            _full(w2), _full(b2),
            _full(w3), _full(b3),
            _full(wf), _full(bfc),
        ],
        out_specs=pl.BlockSpec((1, Bc, E), lambda i: (i, 0, 0)),
        compiler_params=pltpu.CompilerParams(
            dimension_semantics=("parallel",),
            vmem_limit_bytes=32 * 1024 * 1024),
        cost_estimate=pl.CostEstimate(flops=int(flops), transcendentals=int(B),
                                      bytes_accessed=int(bytes_accessed)),
    )(x, w1, b1, w2, b2, w3, b3, wf, bfc)
    return out.reshape(B, E)


@functools.partial(jax.jit, static_argnames=("batch_chunk",))
def speaker_verification_forward(x_nchw, params, batch_chunk=None):
    # batch_chunk < B splits the batch over "parallel" grid steps (dual-core
    # chips); default picks it from the device kind.
    return _forward_pallas(x_nchw, params, batch_chunk)


# ----------------------------------------------------------------------------
# Pure-JAX reference (correctness check only)
# ----------------------------------------------------------------------------
@jax.jit
def reference_forward(x_nchw, params):
    x = jnp.transpose(x_nchw, (0, 2, 3, 1))

    def conv(x, w, b):
        y = lax.conv_general_dilated(
            x, w, window_strides=(1, 1), padding="SAME",
            dimension_numbers=("NHWC", "HWIO", "NHWC"),
            precision=lax.Precision.HIGHEST)
        return jax.nn.relu(y + b)

    def pool(x):
        return lax.reduce_window(x, -jnp.inf, lax.max,
                                 (1, 2, 2, 1), (1, 2, 2, 1), "VALID")

    x = pool(conv(x, params["w1"], params["b1"]))
    x = pool(conv(x, params["w2"], params["b2"]))
    x = conv(x, params["w3"], params["b3"])
    g = jnp.mean(x, axis=(1, 2))
    e = g @ params["wf"] + params["bf"]
    n = jnp.sqrt(jnp.sum(e * e, axis=1, keepdims=True))
    return e / jnp.maximum(n, 1e-12)


# ----------------------------------------------------------------------------
if __name__ == "__main__":
    key = jax.random.PRNGKey(0)
    keys = jax.random.split(key, 9)
    B, H, W = 2, 16, 16
    embed_dim = 128

    # Deterministic synthetic parameters, HWIO conv layout: (3, 3, Cin, Cout).
    params = {
        "w1": 0.1 * jax.random.normal(keys[0], (3, 3, 1, 16), jnp.float32),
        "b1": 0.1 * jax.random.normal(keys[1], (16,), jnp.float32),
        "w2": 0.1 * jax.random.normal(keys[2], (3, 3, 16, 32), jnp.float32),
        "b2": 0.1 * jax.random.normal(keys[3], (32,), jnp.float32),
        "w3": 0.1 * jax.random.normal(keys[4], (3, 3, 32, 64), jnp.float32),
        "b3": 0.1 * jax.random.normal(keys[5], (64,), jnp.float32),
        "wf": 0.1 * jax.random.normal(keys[6], (64, embed_dim), jnp.float32),
        "bf": 0.1 * jax.random.normal(keys[7], (embed_dim,), jnp.float32),
    }
    x = jax.random.normal(keys[8], (B, 1, H, W), jnp.float32)   # NCHW like PyTorch

    out = jax.block_until_ready(speaker_verification_forward(x, params))
    ref = jax.block_until_ready(reference_forward(x, params))

    assert out.shape == (B, embed_dim), out.shape
    max_diff = float(np.max(np.abs(np.asarray(out) - np.asarray(ref))))
    if not np.allclose(np.asarray(out), np.asarray(ref), atol=2e-2, rtol=2e-2):
        raise AssertionError(f"Pallas vs reference mismatch, max abs diff={max_diff}")
    print("KERNEL_OK")
</pallas_src>

<mosaic_0001>
module attributes {stable_mosaic.version = 11 : i64} {
  func.func @_fused_kernel(%arg0: i32, %arg1: memref<1x2x16x16xf32, #tpu.memory_space<vmem>>, %arg2: memref<3x16x256xbf16, #tpu.memory_space<vmem>>, %arg3: memref<1x256xf32, #tpu.memory_space<vmem>>, %arg4: memref<3x256x256xbf16, #tpu.memory_space<vmem>>, %arg5: memref<1x256xf32, #tpu.memory_space<vmem>>, %arg6: memref<3x256x256xbf16, #tpu.memory_space<vmem>>, %arg7: memref<1x256xf32, #tpu.memory_space<vmem>>, %arg8: memref<256x128xbf16, #tpu.memory_space<vmem>>, %arg9: memref<1x128xf32, #tpu.memory_space<vmem>>, %arg10: memref<1x2x128xf32, #tpu.memory_space<vmem>>) attributes {dimension_semantics = [#tpu.dimension_semantics<parallel>], iteration_bounds = array<i64: 1>, scalar_prefetch = 0 : i64, scratch_operands = 0 : i64, tpu.core_type = #tpu.core_type<tc>, window_params = [{transform_indices = @transform_0, window_bounds = array<i64: 1, 2, 16, 16>}, {pipeline_mode = #tpu.pipeline_mode<synchronous>, transform_indices = @transform_1, window_bounds = array<i64: 3, 16, 256>}, {pipeline_mode = #tpu.pipeline_mode<synchronous>, transform_indices = @transform_2, window_bounds = array<i64: 1, 256>}, {pipeline_mode = #tpu.pipeline_mode<synchronous>, transform_indices = @transform_3, window_bounds = array<i64: 3, 256, 256>}, {pipeline_mode = #tpu.pipeline_mode<synchronous>, transform_indices = @transform_4, window_bounds = array<i64: 1, 256>}, {pipeline_mode = #tpu.pipeline_mode<synchronous>, transform_indices = @transform_5, window_bounds = array<i64: 3, 256, 256>}, {pipeline_mode = #tpu.pipeline_mode<synchronous>, transform_indices = @transform_6, window_bounds = array<i64: 1, 256>}, {pipeline_mode = #tpu.pipeline_mode<synchronous>, transform_indices = @transform_7, window_bounds = array<i64: 256, 128>}, {pipeline_mode = #tpu.pipeline_mode<synchronous>, transform_indices = @transform_8, window_bounds = array<i64: 1, 128>}, {transform_indices = @transform_9, window_bounds = array<i64: 1, 2, 128>}]} {
    %0 = tpu.iota {dimensions = array<i32: 0>} : vector<32x1xi32>
    %c16_i32 = arith.constant 16 : i32
    %c0_i32 = arith.constant 0 : i32
    %1 = arith.cmpi eq, %c16_i32, %c0_i32 : i32
    %c1_i32 = arith.constant 1 : i32
    %2 = arith.select %1, %c1_i32, %c16_i32 : i32
    %3 = vector.broadcast %2 : i32 to vector<32x1xi32>
    %4 = arith.remsi %0, %3 : vector<32x1xi32>
    %c0_i32_0 = arith.constant 0 : i32
    %5 = vector.broadcast %c0_i32_0 : i32 to vector<32x1xi32>
    %6 = arith.cmpi ne, %4, %5 : vector<32x1xi32>
    %c0_i32_1 = arith.constant 0 : i32
    %7 = vector.broadcast %c0_i32_1 : i32 to vector<32x1xi32>
    %8 = arith.cmpi slt, %4, %7 : vector<32x1xi32>
    %c0_i32_2 = arith.constant 0 : i32
    %9 = arith.cmpi slt, %2, %c0_i32_2 : i32
    %10 = vector.broadcast %9 : i1 to vector<32x1xi1>
    %11 = vector.broadcast %10 : vector<32x1xi1> to vector<32x1xi1>
    %12 = arith.xori %8, %11 : vector<32x1xi1>
    %13 = arith.andi %12, %6 : vector<32x1xi1>
    %14 = vector.broadcast %2 : i32 to vector<32x1xi32>
    %15 = arith.addi %4, %14 : vector<32x1xi32>
    %16 = arith.select %13, %15, %4 : vector<32x1xi1>, vector<32x1xi32>
    %c0 = arith.constant 0 : index
    %c0_3 = arith.constant 0 : index
    %c0_4 = arith.constant 0 : index
    %c0_5 = arith.constant 0 : index
    %17 = vector.load %arg1[%c0, %c0_3, %c0_4, %c0_5] : memref<1x2x16x16xf32, #tpu.memory_space<vmem>>, vector<1x2x16x16xf32>
    %18 = vector.shape_cast %17 : vector<1x2x16x16xf32> to vector<32x16xf32>
    %c0_6 = arith.constant 0 : index
    %c0_7 = arith.constant 0 : index
    %19 = vector.load %arg3[%c0_6, %c0_7] : memref<1x256xf32, #tpu.memory_space<vmem>>, vector<1x256xf32>
    %20 = arith.truncf %18 : vector<32x16xf32> to vector<32x16xbf16>
    %c0_8 = arith.constant 0 : index
    %c0_9 = arith.constant 0 : index
    %c0_10 = arith.constant 0 : index
    %21 = vector.load %arg2[%c0_8, %c0_9, %c0_10] : memref<3x16x256xbf16, #tpu.memory_space<vmem>>, vector<1x16x256xbf16>
    %22 = vector.shape_cast %21 : vector<1x16x256xbf16> to vector<16x256xbf16>
    %cst = arith.constant dense<0.000000e+00> : vector<32x256xf32>
    %23 = tpu.matmul %20, %22, %cst {dimension_numbers = #tpu.dot_dimension_numbers<[1], [0], [0], [1], [0, 0, 1, 1], [], []>} : vector<32x16xbf16>, vector<16x256xbf16>, vector<32x256xf32> -> vector<32x256xf32>
    %c1 = arith.constant 1 : index
    %c0_11 = arith.constant 0 : index
    %c0_12 = arith.constant 0 : index
    %24 = vector.load %arg2[%c1, %c0_11, %c0_12] : memref<3x16x256xbf16, #tpu.memory_space<vmem>>, vector<1x16x256xbf16>
    %25 = vector.shape_cast %24 : vector<1x16x256xbf16> to vector<16x256xbf16>
    %cst_13 = arith.constant dense<0.000000e+00> : vector<32x256xf32>
    %26 = tpu.matmul %20, %25, %cst_13 {dimension_numbers = #tpu.dot_dimension_numbers<[1], [0], [0], [1], [0, 0, 1, 1], [], []>} : vector<32x16xbf16>, vector<16x256xbf16>, vector<32x256xf32> -> vector<32x256xf32>
    %c2 = arith.constant 2 : index
    %c0_14 = arith.constant 0 : index
    %c0_15 = arith.constant 0 : index
    %27 = vector.load %arg2[%c2, %c0_14, %c0_15] : memref<3x16x256xbf16, #tpu.memory_space<vmem>>, vector<1x16x256xbf16>
    %28 = vector.shape_cast %27 : vector<1x16x256xbf16> to vector<16x256xbf16>
    %cst_16 = arith.constant dense<0.000000e+00> : vector<32x256xf32>
    %29 = tpu.matmul %20, %28, %cst_16 {dimension_numbers = #tpu.dot_dimension_numbers<[1], [0], [0], [1], [0, 0, 1, 1], [], []>} : vector<32x16xbf16>, vector<16x256xbf16>, vector<32x256xf32> -> vector<32x256xf32>
    %c1_i32_17 = arith.constant 1 : i32
    %30 = vector.broadcast %c1_i32_17 : i32 to vector<32x1xi32>
    %31 = arith.cmpi sge, %16, %30 : vector<32x1xi32>
    %cst_18 = arith.constant 0.000000e+00 : f32
    %32 = vector.broadcast %cst_18 : f32 to vector<1x256xf32>
    %33 = vector.extract_strided_slice %23 {offsets = [0, 0], sizes = [31, 256], strides = [1, 1]} : vector<32x256xf32> to vector<31x256xf32>
    %34 = tpu.concatenate %32, %33 in 0 : vector<1x256xf32>, vector<31x256xf32> -> vector<32x256xf32>
    %cst_19 = arith.constant 0.000000e+00 : f32
    %35 = vector.shape_cast %31 : vector<32x1xi1> to vector<32x1xi1>
    %36 = vector.broadcast %35 : vector<32x1xi1> to vector<32x256xi1>
    %37 = vector.broadcast %cst_19 : f32 to vector<32x256xf32>
    %38 = arith.select %36, %34, %37 : vector<32x256xi1>, vector<32x256xf32>
    %c15_i32 = arith.constant 15 : i32
    %39 = vector.broadcast %c15_i32 : i32 to vector<32x1xi32>
    %40 = arith.cmpi slt, %16, %39 : vector<32x1xi32>
    %cst_20 = arith.constant 0.000000e+00 : f32
    %41 = vector.broadcast %cst_20 : f32 to vector<1x256xf32>
    %42 = vector.extract_strided_slice %29 {offsets = [1, 0], sizes = [31, 256], strides = [1, 1]} : vector<32x256xf32> to vector<31x256xf32>
    %43 = tpu.concatenate %42, %41 in 0 : vector<31x256xf32>, vector<1x256xf32> -> vector<32x256xf32>
    %cst_21 = arith.constant 0.000000e+00 : f32
    %44 = vector.shape_cast %40 : vector<32x1xi1> to vector<32x1xi1>
    %45 = vector.broadcast %44 : vector<32x1xi1> to vector<32x256xi1>
    %46 = vector.broadcast %cst_21 : f32 to vector<32x256xf32>
    %47 = arith.select %45, %43, %46 : vector<32x256xi1>, vector<32x256xf32>
    %48 = arith.addf %26, %38 : vector<32x256xf32>
    %49 = arith.addf %48, %47 : vector<32x256xf32>
    %50 = vector.broadcast %19 : vector<1x256xf32> to vector<32x256xf32>
    %51 = arith.addf %49, %50 : vector<32x256xf32>
    %cst_22 = arith.constant 0.000000e+00 : f32
    %52 = vector.broadcast %cst_22 : f32 to vector<32x256xf32>
    %53 = arith.maximumf %51, %52 : vector<32x256xf32>
    %cst_23 = arith.constant 0.000000e+00 : f32
    %54 = vector.broadcast %cst_23 : f32 to vector<32x16xf32>
    %55 = vector.extract_strided_slice %53 {offsets = [0, 16], sizes = [32, 240], strides = [1, 1]} : vector<32x256xf32> to vector<32x240xf32>
    %56 = tpu.concatenate %55, %54 in 1 : vector<32x240xf32>, vector<32x16xf32> -> vector<32x256xf32>
    %57 = arith.maximumf %53, %56 : vector<32x256xf32>
    %cst_24 = arith.constant 0.000000e+00 : f32
    %58 = vector.broadcast %cst_24 : f32 to vector<1x256xf32>
    %59 = vector.extract_strided_slice %57 {offsets = [1, 0], sizes = [31, 256], strides = [1, 1]} : vector<32x256xf32> to vector<31x256xf32>
    %60 = tpu.concatenate %59, %58 in 0 : vector<31x256xf32>, vector<1x256xf32> -> vector<32x256xf32>
    %61 = arith.maximumf %57, %60 : vector<32x256xf32>
    %c0_25 = arith.constant 0 : index
    %c0_26 = arith.constant 0 : index
    %62 = vector.load %arg5[%c0_25, %c0_26] : memref<1x256xf32, #tpu.memory_space<vmem>>, vector<1x256xf32>
    %63 = arith.truncf %61 : vector<32x256xf32> to vector<32x256xbf16>
    %c0_27 = arith.constant 0 : index
    %c0_28 = arith.constant 0 : index
    %c0_29 = arith.constant 0 : index
    %64 = vector.load %arg4[%c0_27, %c0_28, %c0_29] : memref<3x256x256xbf16, #tpu.memory_space<vmem>>, vector<1x256x256xbf16>
    %65 = vector.shape_cast %64 : vector<1x256x256xbf16> to vector<256x256xbf16>
    %cst_30 = arith.constant dense<0.000000e+00> : vector<32x256xf32>
    %66 = tpu.matmul %63, %65, %cst_30 {dimension_numbers = #tpu.dot_dimension_numbers<[1], [0], [0], [1], [0, 0, 1, 1], [], []>} : vector<32x256xbf16>, vector<256x256xbf16>, vector<32x256xf32> -> vector<32x256xf32>
    %c1_31 = arith.constant 1 : index
    %c0_32 = arith.constant 0 : index
    %c0_33 = arith.constant 0 : index
    %67 = vector.load %arg4[%c1_31, %c0_32, %c0_33] : memref<3x256x256xbf16, #tpu.memory_space<vmem>>, vector<1x256x256xbf16>
    %68 = vector.shape_cast %67 : vector<1x256x256xbf16> to vector<256x256xbf16>
    %cst_34 = arith.constant dense<0.000000e+00> : vector<32x256xf32>
    %69 = tpu.matmul %63, %68, %cst_34 {dimension_numbers = #tpu.dot_dimension_numbers<[1], [0], [0], [1], [0, 0, 1, 1], [], []>} : vector<32x256xbf16>, vector<256x256xbf16>, vector<32x256xf32> -> vector<32x256xf32>
    %c2_35 = arith.constant 2 : index
    %c0_36 = arith.constant 0 : index
    %c0_37 = arith.constant 0 : index
    %70 = vector.load %arg4[%c2_35, %c0_36, %c0_37] : memref<3x256x256xbf16, #tpu.memory_space<vmem>>, vector<1x256x256xbf16>
    %71 = vector.shape_cast %70 : vector<1x256x256xbf16> to vector<256x256xbf16>
    %cst_38 = arith.constant dense<0.000000e+00> : vector<32x256xf32>
    %72 = tpu.matmul %63, %71, %cst_38 {dimension_numbers = #tpu.dot_dimension_numbers<[1], [0], [0], [1], [0, 0, 1, 1], [], []>} : vector<32x256xbf16>, vector<256x256xbf16>, vector<32x256xf32> -> vector<32x256xf32>
    %c2_i32 = arith.constant 2 : i32
    %73 = vector.broadcast %c2_i32 : i32 to vector<32x1xi32>
    %74 = arith.cmpi sge, %16, %73 : vector<32x1xi32>
    %cst_39 = arith.constant 0.000000e+00 : f32
    %75 = vector.broadcast %cst_39 : f32 to vector<2x256xf32>
    %76 = vector.extract_strided_slice %66 {offsets = [0, 0], sizes = [30, 256], strides = [1, 1]} : vector<32x256xf32> to vector<30x256xf32>
    %77 = tpu.concatenate %75, %76 in 0 : vector<2x256xf32>, vector<30x256xf32> -> vector<32x256xf32>
    %cst_40 = arith.constant 0.000000e+00 : f32
    %78 = vector.shape_cast %74 : vector<32x1xi1> to vector<32x1xi1>
    %79 = vector.broadcast %78 : vector<32x1xi1> to vector<32x256xi1>
    %80 = vector.broadcast %cst_40 : f32 to vector<32x256xf32>
    %81 = arith.select %79, %77, %80 : vector<32x256xi1>, vector<32x256xf32>
    %c14_i32 = arith.constant 14 : i32
    %82 = vector.broadcast %c14_i32 : i32 to vector<32x1xi32>
    %83 = arith.cmpi slt, %16, %82 : vector<32x1xi32>
    %cst_41 = arith.constant 0.000000e+00 : f32
    %84 = vector.broadcast %cst_41 : f32 to vector<2x256xf32>
    %85 = vector.extract_strided_slice %72 {offsets = [2, 0], sizes = [30, 256], strides = [1, 1]} : vector<32x256xf32> to vector<30x256xf32>
    %86 = tpu.concatenate %85, %84 in 0 : vector<30x256xf32>, vector<2x256xf32> -> vector<32x256xf32>
    %cst_42 = arith.constant 0.000000e+00 : f32
    %87 = vector.shape_cast %83 : vector<32x1xi1> to vector<32x1xi1>
    %88 = vector.broadcast %87 : vector<32x1xi1> to vector<32x256xi1>
    %89 = vector.broadcast %cst_42 : f32 to vector<32x256xf32>
    %90 = arith.select %88, %86, %89 : vector<32x256xi1>, vector<32x256xf32>
    %91 = arith.addf %69, %81 : vector<32x256xf32>
    %92 = arith.addf %91, %90 : vector<32x256xf32>
    %93 = vector.broadcast %62 : vector<1x256xf32> to vector<32x256xf32>
    %94 = arith.addf %92, %93 : vector<32x256xf32>
    %cst_43 = arith.constant 0.000000e+00 : f32
    %95 = vector.broadcast %cst_43 : f32 to vector<32x256xf32>
    %96 = arith.maximumf %94, %95 : vector<32x256xf32>
    %cst_44 = arith.constant 0.000000e+00 : f32
    %97 = vector.broadcast %cst_44 : f32 to vector<32x32xf32>
    %98 = vector.extract_strided_slice %96 {offsets = [0, 32], sizes = [32, 224], strides = [1, 1]} : vector<32x256xf32> to vector<32x224xf32>
    %99 = tpu.concatenate %98, %97 in 1 : vector<32x224xf32>, vector<32x32xf32> -> vector<32x256xf32>
    %100 = arith.maximumf %96, %99 : vector<32x256xf32>
    %cst_45 = arith.constant 0.000000e+00 : f32
    %101 = vector.broadcast %cst_45 : f32 to vector<2x256xf32>
    %102 = vector.extract_strided_slice %100 {offsets = [2, 0], sizes = [30, 256], strides = [1, 1]} : vector<32x256xf32> to vector<30x256xf32>
    %103 = tpu.concatenate %102, %101 in 0 : vector<30x256xf32>, vector<2x256xf32> -> vector<32x256xf32>
    %104 = arith.maximumf %100, %103 : vector<32x256xf32>
    %c0_46 = arith.constant 0 : index
    %c0_47 = arith.constant 0 : index
    %105 = vector.load %arg7[%c0_46, %c0_47] : memref<1x256xf32, #tpu.memory_space<vmem>>, vector<1x256xf32>
    %106 = arith.truncf %104 : vector<32x256xf32> to vector<32x256xbf16>
    %c0_48 = arith.constant 0 : index
    %c0_49 = arith.constant 0 : index
    %c0_50 = arith.constant 0 : index
    %107 = vector.load %arg6[%c0_48, %c0_49, %c0_50] : memref<3x256x256xbf16, #tpu.memory_space<vmem>>, vector<1x256x256xbf16>
    %108 = vector.shape_cast %107 : vector<1x256x256xbf16> to vector<256x256xbf16>
    %cst_51 = arith.constant dense<0.000000e+00> : vector<32x256xf32>
    %109 = tpu.matmul %106, %108, %cst_51 {dimension_numbers = #tpu.dot_dimension_numbers<[1], [0], [0], [1], [0, 0, 1, 1], [], []>} : vector<32x256xbf16>, vector<256x256xbf16>, vector<32x256xf32> -> vector<32x256xf32>
    %c1_52 = arith.constant 1 : index
    %c0_53 = arith.constant 0 : index
    %c0_54 = arith.constant 0 : index
    %110 = vector.load %arg6[%c1_52, %c0_53, %c0_54] : memref<3x256x256xbf16, #tpu.memory_space<vmem>>, vector<1x256x256xbf16>
    %111 = vector.shape_cast %110 : vector<1x256x256xbf16> to vector<256x256xbf16>
    %cst_55 = arith.constant dense<0.000000e+00> : vector<32x256xf32>
    %112 = tpu.matmul %106, %111, %cst_55 {dimension_numbers = #tpu.dot_dimension_numbers<[1], [0], [0], [1], [0, 0, 1, 1], [], []>} : vector<32x256xbf16>, vector<256x256xbf16>, vector<32x256xf32> -> vector<32x256xf32>
    %c2_56 = arith.constant 2 : index
    %c0_57 = arith.constant 0 : index
    %c0_58 = arith.constant 0 : index
    %113 = vector.load %arg6[%c2_56, %c0_57, %c0_58] : memref<3x256x256xbf16, #tpu.memory_space<vmem>>, vector<1x256x256xbf16>
    %114 = vector.shape_cast %113 : vector<1x256x256xbf16> to vector<256x256xbf16>
    %cst_59 = arith.constant dense<0.000000e+00> : vector<32x256xf32>
    %115 = tpu.matmul %106, %114, %cst_59 {dimension_numbers = #tpu.dot_dimension_numbers<[1], [0], [0], [1], [0, 0, 1, 1], [], []>} : vector<32x256xbf16>, vector<256x256xbf16>, vector<32x256xf32> -> vector<32x256xf32>
    %c4_i32 = arith.constant 4 : i32
    %116 = vector.broadcast %c4_i32 : i32 to vector<32x1xi32>
    %117 = arith.cmpi sge, %16, %116 : vector<32x1xi32>
    %cst_60 = arith.constant 0.000000e+00 : f32
    %118 = vector.broadcast %cst_60 : f32 to vector<4x256xf32>
    %119 = vector.extract_strided_slice %109 {offsets = [0, 0], sizes = [28, 256], strides = [1, 1]} : vector<32x256xf32> to vector<28x256xf32>
    %120 = tpu.concatenate %118, %119 in 0 : vector<4x256xf32>, vector<28x256xf32> -> vector<32x256xf32>
    %cst_61 = arith.constant 0.000000e+00 : f32
    %121 = vector.shape_cast %117 : vector<32x1xi1> to vector<32x1xi1>
    %122 = vector.broadcast %121 : vector<32x1xi1> to vector<32x256xi1>
    %123 = vector.broadcast %cst_61 : f32 to vector<32x256xf32>
    %124 = arith.select %122, %120, %123 : vector<32x256xi1>, vector<32x256xf32>
    %c12_i32 = arith.constant 12 : i32
    %125 = vector.broadcast %c12_i32 : i32 to vector<32x1xi32>
    %126 = arith.cmpi slt, %16, %125 : vector<32x1xi32>
    %cst_62 = arith.constant 0.000000e+00 : f32
    %127 = vector.broadcast %cst_62 : f32 to vector<4x256xf32>
    %128 = vector.extract_strided_slice %115 {offsets = [4, 0], sizes = [28, 256], strides = [1, 1]} : vector<32x256xf32> to vector<28x256xf32>
    %129 = tpu.concatenate %128, %127 in 0 : vector<28x256xf32>, vector<4x256xf32> -> vector<32x256xf32>
    %cst_63 = arith.constant 0.000000e+00 : f32
    %130 = vector.shape_cast %126 : vector<32x1xi1> to vector<32x1xi1>
    %131 = vector.broadcast %130 : vector<32x1xi1> to vector<32x256xi1>
    %132 = vector.broadcast %cst_63 : f32 to vector<32x256xf32>
    %133 = arith.select %131, %129, %132 : vector<32x256xi1>, vector<32x256xf32>
    %134 = arith.addf %112, %124 : vector<32x256xf32>
    %135 = arith.addf %134, %133 : vector<32x256xf32>
    %136 = vector.broadcast %105 : vector<1x256xf32> to vector<32x256xf32>
    %137 = arith.addf %135, %136 : vector<32x256xf32>
    %cst_64 = arith.constant 0.000000e+00 : f32
    %138 = vector.broadcast %cst_64 : f32 to vector<32x256xf32>
    %139 = arith.maximumf %137, %138 : vector<32x256xf32>
    %c4_i32_65 = arith.constant 4 : i32
    %c0_i32_66 = arith.constant 0 : i32
    %140 = arith.cmpi eq, %c4_i32_65, %c0_i32_66 : i32
    %c1_i32_67 = arith.constant 1 : i32
    %141 = arith.select %140, %c1_i32_67, %c4_i32_65 : i32
    %142 = vector.broadcast %141 : i32 to vector<32x1xi32>
    %143 = arith.remsi %16, %142 : vector<32x1xi32>
    %c0_i32_68 = arith.constant 0 : i32
    %144 = vector.broadcast %c0_i32_68 : i32 to vector<32x1xi32>
    %145 = arith.cmpi ne, %143, %144 : vector<32x1xi32>
    %c0_i32_69 = arith.constant 0 : i32
    %146 = vector.broadcast %c0_i32_69 : i32 to vector<32x1xi32>
    %147 = arith.cmpi slt, %143, %146 : vector<32x1xi32>
    %c0_i32_70 = arith.constant 0 : i32
    %148 = arith.cmpi slt, %141, %c0_i32_70 : i32
    %149 = vector.broadcast %148 : i1 to vector<32x1xi1>
    %150 = vector.broadcast %149 : vector<32x1xi1> to vector<32x1xi1>
    %151 = arith.xori %147, %150 : vector<32x1xi1>
    %152 = arith.andi %151, %145 : vector<32x1xi1>
    %153 = vector.broadcast %141 : i32 to vector<32x1xi32>
    %154 = arith.addi %143, %153 : vector<32x1xi32>
    %155 = arith.select %152, %154, %143 : vector<32x1xi1>, vector<32x1xi32>
    %c0_i32_71 = arith.constant 0 : i32
    %156 = vector.broadcast %c0_i32_71 : i32 to vector<32x1xi32>
    %157 = arith.cmpi eq, %155, %156 : vector<32x1xi32>
    %cst_72 = arith.constant 0.000000e+00 : f32
    %158 = vector.shape_cast %157 : vector<32x1xi1> to vector<32x1xi1>
    %159 = vector.broadcast %158 : vector<32x1xi1> to vector<32x256xi1>
    %160 = vector.broadcast %cst_72 : f32 to vector<32x256xf32>
    %161 = arith.select %159, %139, %160 : vector<32x256xi1>, vector<32x256xf32>
    %162 = vector.shape_cast %161 : vector<32x256xf32> to vector<2x16x256xf32>
    %cst_73 = arith.constant dense<0.000000e+00> : vector<2x256xf32>
    %163 = vector.multi_reduction <add>, %162, %cst_73 [1] : vector<2x16x256xf32> to vector<2x256xf32>
    %164 = arith.truncf %163 : vector<2x256xf32> to vector<2x256xbf16>
    %c0_74 = arith.constant 0 : index
    %c0_75 = arith.constant 0 : index
    %165 = vector.load %arg8[%c0_74, %c0_75] : memref<256x128xbf16, #tpu.memory_space<vmem>>, vector<256x128xbf16>
    %cst_76 = arith.constant dense<0.000000e+00> : vector<2x128xf32>
    %166 = tpu.matmul %164, %165, %cst_76 {dimension_numbers = #tpu.dot_dimension_numbers<[1], [0], [0], [1], [0, 0, 1, 1], [], []>} : vector<2x256xbf16>, vector<256x128xbf16>, vector<2x128xf32> -> vector<2x128xf32>
    %c0_77 = arith.constant 0 : index
    %c0_78 = arith.constant 0 : index
    %167 = vector.load %arg9[%c0_77, %c0_78] : memref<1x128xf32, #tpu.memory_space<vmem>>, vector<1x128xf32>
    %168 = vector.broadcast %167 : vector<1x128xf32> to vector<2x128xf32>
    %169 = arith.addf %166, %168 : vector<2x128xf32>
    %170 = arith.mulf %169, %169 : vector<2x128xf32>
    %cst_79 = arith.constant dense<0.000000e+00> : vector<2xf32>
    %171 = vector.multi_reduction <add>, %170, %cst_79 [1] : vector<2x128xf32> to vector<2xf32>
    %172 = vector.shape_cast %171 : vector<2xf32> to vector<2x1xf32>
    %cst_80 = arith.constant 1.000000e-24 : f32
    %173 = vector.broadcast %cst_80 : f32 to vector<2x1xf32>
    %174 = arith.maximumf %172, %173 : vector<2x1xf32>
    %175 = math.rsqrt %174 : vector<2x1xf32>
    %176 = vector.broadcast %175 : vector<2x1xf32> to vector<2x128xf32>
    %177 = arith.mulf %169, %176 : vector<2x128xf32>
    %178 = vector.shape_cast %177 : vector<2x128xf32> to vector<1x2x128xf32>
    %c0_81 = arith.constant 0 : index
    %c0_82 = arith.constant 0 : index
    %c0_83 = arith.constant 0 : index
    %179 = vector.load %arg10[%c0_81, %c0_82, %c0_83] : memref<1x2x128xf32, #tpu.memory_space<vmem>>, vector<1x2x128xf32>
    tpu.vector_store %arg10[%c0_81, %c0_82, %c0_83], %178 {strides = array<i32>} : memref<1x2x128xf32, #tpu.memory_space<vmem>>, vector<1x2x128xf32>,
    return
  }
  func.func @transform_0(%arg0: i32) -> (i32, i32, i32, i32) {
    %c0_i32 = arith.constant 0 : i32
    %c0_i32_0 = arith.constant 0 : i32
    %c0_i32_1 = arith.constant 0 : i32
    %c0_i32_2 = arith.constant 0 : i32
    return %arg0, %c0_i32, %c0_i32_0, %c0_i32_1 : i32, i32, i32, i32
  }
  func.func @transform_1(%arg0: i32) -> (i32, i32, i32) {
    %c0_i32 = arith.constant 0 : i32
    %c0_i32_0 = arith.constant 0 : i32
    %c0_i32_1 = arith.constant 0 : i32
    %c0_i32_2 = arith.constant 0 : i32
    return %c0_i32, %c0_i32_0, %c0_i32_1 : i32, i32, i32
  }
  func.func @transform_2(%arg0: i32) -> (i32, i32) {
    %c0_i32 = arith.constant 0 : i32
    %c0_i32_0 = arith.constant 0 : i32
    %c0_i32_1 = arith.constant 0 : i32
    return %c0_i32, %c0_i32_0 : i32, i32
  }
  func.func @transform_3(%arg0: i32) -> (i32, i32, i32) {
    %c0_i32 = arith.constant 0 : i32
    %c0_i32_0 = arith.constant 0 : i32
    %c0_i32_1 = arith.constant 0 : i32
    %c0_i32_2 = arith.constant 0 : i32
    return %c0_i32, %c0_i32_0, %c0_i32_1 : i32, i32, i32
  }
  func.func @transform_4(%arg0: i32) -> (i32, i32) {
    %c0_i32 = arith.constant 0 : i32
    %c0_i32_0 = arith.constant 0 : i32
    %c0_i32_1 = arith.constant 0 : i32
    return %c0_i32, %c0_i32_0 : i32, i32
  }
  func.func @transform_5(%arg0: i32) -> (i32, i32, i32) {
    %c0_i32 = arith.constant 0 : i32
    %c0_i32_0 = arith.constant 0 : i32
    %c0_i32_1 = arith.constant 0 : i32
    %c0_i32_2 = arith.constant 0 : i32
    return %c0_i32, %c0_i32_0, %c0_i32_1 : i32, i32, i32
  }
  func.func @transform_6(%arg0: i32) -> (i32, i32) {
    %c0_i32 = arith.constant 0 : i32
    %c0_i32_0 = arith.constant 0 : i32
    %c0_i32_1 = arith.constant 0 : i32
    return %c0_i32, %c0_i32_0 : i32, i32
  }
  func.func @transform_7(%arg0: i32) -> (i32, i32) {
    %c0_i32 = arith.constant 0 : i32
    %c0_i32_0 = arith.constant 0 : i32
    %c0_i32_1 = arith.constant 0 : i32
    return %c0_i32, %c0_i32_0 : i32, i32
  }
  func.func @transform_8(%arg0: i32) -> (i32, i32) {
    %c0_i32 = arith.constant 0 : i32
    %c0_i32_0 = arith.constant 0 : i32
    %c0_i32_1 = arith.constant 0 : i32
    return %c0_i32, %c0_i32_0 : i32, i32
  }
  func.func @transform_9(%arg0: i32) -> (i32, i32, i32) {
    %c0_i32 = arith.constant 0 : i32
    %c0_i32_0 = arith.constant 0 : i32
    %c0_i32_1 = arith.constant 0 : i32
    return %arg0, %c0_i32, %c0_i32_0 : i32, i32, i32
  }
}

</mosaic_0001>

<bundles_post_ra>
// kernel: tile.19
= control target key start
LH: loop header
LB: loop body
LE: loop exit
PB: predicated region body
PF: predicated region fallthrough
CT: control target
= control target key end

     0   :  { %s7_s6 = smov 3  ;;  %s21_s9 = smov 3  ;;  %vm4_vm0 = vcmask 130048   ;;  %vm11_vm1 = vcmask 1048448   ;;  %vm18_vm2 = vcmask 917248   ;;  %vm25_vm3 = vcmask 786048   ;;  %s128_s0 = inlined_call_operand.vmem [shape: f32[16,16], index: 0, kind: input, shape index: {}]   ;;  %s129_s1 = inlined_call_operand.vmem [shape: f32[1,256], index: 1, kind: output, shape index: {}]  }
   0x1   :  { %v66_v0 = vld [vmem:[%s128_s0 + $0x7] ss:$8 sm:%s7_s6]   ;;  %s81_s10 = smov 112   ;;  %v68_v1 = vld [vmem:[%s128_s0 + $0x5] ss:$8 sm:%s21_s9]   ;;  %s14_s13 = smov 3 }
   0x2   :  { %9 = vrot.lane.b32.xlu0 %v66_v0, %s81_s10  ;;  %s82_s14 = smov 80   ;;  %v67_v2 = vld [vmem:[%s128_s0 + $0x6] ss:$8 sm:%s14_s13]   ;;  %s28_s17 = smov 3  ;;  %vm32_vm4 = vcmask 654848   ;;  %vm39_vm5 = vcmask 523648  }
   0x3   :  { %23 = vrot.lane.b32.xlu1 %v68_v1, %s82_s14  ;;  %v69_v3 = vld [vmem:[%s128_s0 + $0x4] ss:$8 sm:%s28_s17]   ;;  %s35_s20 = smov 3  ;;  %s42_s21 = smov 3  ;;  %vm46_vm6 = vcmask 392448   ;;  %vm53_vm7 = vcmask 261248  }
   0x4   :  { %s83_s22 = smov 96   ;;  %s84_s23 = smov 64   ;;  %v70_v4 = vld [vmem:[%s128_s0 + $0x3] ss:$8 sm:%s35_s20]   ;;  %v71_v5 = vld [vmem:[%s128_s0 + $0x2] ss:$8 sm:%s42_s21]  }
   0x5   :  { %s2_s26 = smov 3  ;;  %s49_s29 = smov 3 }
   0x6   :  { %16 = vrot.lane.b32.xlu0 %v67_v2, %s83_s22  ;;  %v3_v6 = vld [vmem:[%s128_s0] ss:$8 sm:%s2_s26]   ;;  %s85_s3 = smov 48   ;;  %s86_s4 = smov 32  }
   0x7   :  { %30 = vrot.lane.b32.xlu1 %v69_v3, %s84_s23  ;;  %5 = vst.msk [vmem:[#allocation0] ss:$8 sm:$0x3] %vm4_vm0, %v3_v6   ;;  %v72_v7 = vld [vmem:[%s128_s0 + $0x1] ss:$8 sm:%s49_s29]   ;;  %s87_s0 = smov 16  }
   0xa   :  { %37 = vrot.lane.b32.xlu0 %v70_v4, %s85_s3 }
   0xb   :  { %44 = vrot.lane.b32.xlu1 %v71_v5, %s86_s4 }
   0xe   :  { %51 = vrot.lane.b32.xlu0 %v72_v7, %s87_s0 }
  0x74   :  { %v10_v8 = vpop.permute.xlu0 %9  }
  0x75   :  { %12 = vst.msk [vmem:[#allocation0] ss:$8 sm:$0x3] %vm11_vm1, %v10_v8   ;;  %v24_v9 = vpop.permute.xlu1 %23  }
  0x78   :  { %v17_v10 = vpop.permute.xlu0 %16  }
  0x79   :  { %19 = vst.msk [vmem:[#allocation0] ss:$8 sm:$0x3] %vm18_vm2, %v17_v10   ;;  %v31_v11 = vpop.permute.xlu1 %30  }
  0x7a   :  { %26 = vst.msk [vmem:[#allocation0] ss:$8 sm:$0x3] %vm25_vm3, %v24_v9  }
  0x7b   :  { %33 = vst.msk [vmem:[#allocation0] ss:$8 sm:$0x3] %vm32_vm4, %v31_v11  }
  0x7c   :  { %v38_v12 = vpop.permute.xlu0 %37  }
  0x7d   :  { %40 = vst.msk [vmem:[#allocation0] ss:$8 sm:$0x3] %vm39_vm5, %v38_v12   ;;  %v45_v13 = vpop.permute.xlu1 %44  }
  0x7e   :  { %47 = vst.msk [vmem:[#allocation0] ss:$8 sm:$0x3] %vm46_vm6, %v45_v13  }
  0x80   :  { %v52_v14 = vpop.permute.xlu0 %51  }
  0x81   :  { %54 = vst.msk [vmem:[#allocation0] ss:$8 sm:$0x3] %vm53_vm7, %v52_v14  }
  0x88   :  { %v58_v15 = vld [vmem:[#allocation0] sm:$0x1]  ;;  %v62_v16 = vld [vmem:[#allocation0 + $0x8] sm:$0x1] }
  0x89   :  { %60 = vst [vmem:[%s129_s1] sm:$0x1] %v58_v15  ;;  %73 = vst [vmem:[%s129_s1 + $0x1] sm:$0x1] %v62_v16 }

// kernel: tile.23
= control target key start
LH: loop header
LB: loop body
LE: loop exit
PB: predicated region body
PF: predicated region fallthrough
CT: control target
= control target key end

     0   :  { %s22_s0 = inlined_call_operand.vmem [shape: f32[32], index: 0, kind: input, shape index: {}]   ;;  %s23_s1 = inlined_call_operand.vmem [shape: f32[8,32], index: 1, kind: output, shape index: {}]  }
   0x1   :  { %v4_v0 = vld [vmem:[%s22_s0] ss:$0 sm:$0xff] }
   0x2   :  { %5 = vst [vmem:[%s23_s1] sm:$0xff] %v4_v0 }

// kernel: tile.24
= control target key start
LH: loop header
LB: loop body
LE: loop exit
PB: predicated region body
PF: predicated region fallthrough
CT: control target
= control target key end

     0   :  { %s7_s6 = smov 3  ;;  %s14_s9 = smov 3  ;;  %vm4_vm0 = vcmask 261120   ;;  %vm11_vm1 = vcmask 1048320   ;;  %vm18_vm2 = vcmask 785920   ;;  %vm25_vm3 = vcmask 523520   ;;  %s76_s0 = inlined_call_operand.vmem [shape: f32[8,32], index: 0, kind: input, shape index: {}]   ;;  %s77_s1 = inlined_call_operand.vmem [shape: f32[1,256], index: 1, kind: output, shape index: {}]  }
   0x1   :  { %v38_v0 = vld [vmem:[%s76_s0 + $0x3] ss:$4 sm:%s7_s6]   ;;  %s45_s10 = smov 96   ;;  %s21_s11 = smov 3  ;;  %v39_v1 = vld [vmem:[%s76_s0 + $0x2] ss:$4 sm:%s14_s9]  }
   0x2   :  { %9 = vrot.lane.b32.xlu0 %v38_v0, %s45_s10  ;;  %v40_v2 = vld [vmem:[%s76_s0 + $0x1] ss:$4 sm:%s21_s11]   ;;  %s2_s16 = smov 3  ;;  %s46_s17 = smov 32  }
   0x3   :  { %23 = vrot.lane.b32.xlu1 %v40_v2, %s46_s17  ;;  %v3_v3 = vld [vmem:[%s76_s0] ss:$4 sm:%s2_s16]   ;;  %s47_s0 = smov 64  }
   0x4   :  { %5 = vst.msk [vmem:[#allocation0] ss:$8 sm:$0x3] %vm4_vm0, %v3_v3  }
   0x6   :  { %16 = vrot.lane.b32.xlu0 %v39_v1, %s47_s0 }
  0x74   :  { %v10_v4 = vpop.permute.xlu0 %9  }
  0x75   :  { %12 = vst.msk [vmem:[#allocation0] ss:$8 sm:$0x3] %vm11_vm1, %v10_v4   ;;  %v24_v5 = vpop.permute.xlu1 %23  }
  0x78   :  { %v17_v6 = vpop.permute.xlu0 %16  }
  0x79   :  { %19 = vst.msk [vmem:[#allocation0] ss:$8 sm:$0x3] %vm18_vm2, %v17_v6  }
  0x7a   :  { %26 = vst.msk [vmem:[#allocation0] ss:$8 sm:$0x3] %vm25_vm3, %v24_v5  }
  0x81   :  { %v30_v7 = vld [vmem:[#allocation0] sm:$0x1]  ;;  %v34_v8 = vld [vmem:[#allocation0 + $0x8] sm:$0x1] }
  0x82   :  { %32 = vst [vmem:[%s77_s1] sm:$0x1] %v30_v7  ;;  %41 = vst [vmem:[%s77_s1 + $0x1] sm:$0x1] %v34_v8 }

// kernel: tile.28
= control target key start
LH: loop header
LB: loop body
LE: loop exit
PB: predicated region body
PF: predicated region fallthrough
CT: control target
= control target key end

     0   :  { %s22_s0 = inlined_call_operand.vmem [shape: f32[64], index: 0, kind: input, shape index: {}]   ;;  %s23_s1 = inlined_call_operand.vmem [shape: f32[4,64], index: 1, kind: output, shape index: {}]  }
   0x1   :  { %v4_v0 = vld [vmem:[%s22_s0] ss:$0 sm:$0xff] }
   0x2   :  { %5 = vst [vmem:[%s23_s1] sm:$0xf] %v4_v0 }

// kernel: tile.29
= control target key start
LH: loop header
LB: loop body
LE: loop exit
PB: predicated region body
PF: predicated region fallthrough
CT: control target
= control target key end

     0   :  { %s6_s8 = smov 3  ;;  %vm8_vm0 = vcmask 523264   ;;  %s30_s9 = smov 64   ;;  %vm15_vm1 = vcmask 1048064   ;;  %s50_s0 = inlined_call_operand.vmem [shape: f32[4,64], index: 0, kind: input, shape index: {}]   ;;  %s51_s1 = inlined_call_operand.vmem [shape: f32[1,256], index: 1, kind: output, shape index: {}]  }
   0x1   :  { %v4_v0 = vld [vmem:[%s50_s0] sm:$0xf]  ;;  %s11_s0 = smov 3 }
   0x2   :  { %5 = vst [vmem:[#allocation1] sm:$0xf] %v4_v0 }
   0x9   :  { %v12_v1 = vld [vmem:[#allocation1 + $0x1] ss:$2 sm:%s11_s0]   ;;  %v7_v2 = vld [vmem:[#allocation1] ss:$2 sm:%s6_s8]  }
   0xa   :  { %13 = vrot.lane.b32.xlu0 %v12_v1, %s30_s9  ;;  %9 = vst.msk [vmem:[#allocation0] ss:$8 sm:$0x3] %vm8_vm0, %v7_v2  }
  0x7c   :  { %v14_v3 = vpop.permute.xlu0 %13  }
  0x7d   :  { %16 = vst.msk [vmem:[#allocation0] ss:$8 sm:$0x3] %vm15_vm1, %v14_v3  }
  0x84   :  { %v20_v4 = vld [vmem:[#allocation0] sm:$0x1]  ;;  %v24_v5 = vld [vmem:[#allocation0 + $0x8] sm:$0x1] }
  0x85   :  { %22 = vst [vmem:[%s51_s1] sm:$0x1] %v20_v4  ;;  %28 = vst [vmem:[%s51_s1 + $0x1] sm:$0x1] %v24_v5 }

// kernel: speaker_verification_forward.1
= control target key start
LH: loop header
LB: loop body
LE: loop exit
PB: predicated region body
PF: predicated region fallthrough
CT: control target
= control target key end

     0   :  { %v3452_v2 = vmov 0   ;;  %vm106_vm0 = vcmask 130048   ;;  %s4427_s0 = inlined_call_operand.vmem [shape: f32[1,2,16,16], index: 0, kind: input, shape index: {}]   ;;  %s4428_s1 = inlined_call_operand.vmem [shape: bf16[3,16,256], index: 1, kind: input, shape index: {}]   ;;  %s4429_s2 = inlined_call_operand.vmem [shape: f32[1,256], index: 2, kind: input, shape index: {}]   ;;  %s4430_s3 = inlined_call_operand.vmem [shape: bf16[3,256,256], index: 3, kind: input, shape index: {}]   ;;  %s4431_s4 = inlined_call_operand.vmem [shape: f32[1,256], index: 4, kind: input, shape index: {}]   ;;  %s4432_s5 = inlined_call_operand.vmem [shape: bf16[3,256,256], index: 5, kind: input, shape index: {}]   ;;  %s4433_s6 = inlined_call_operand.vmem [shape: f32[1,256], index: 6, kind: input, shape index: {}]   ;;  %s4434_s7 = inlined_call_operand.vmem [shape: bf16[256,128], index: 7, kind: input, shape index: {}]   ;;  %s4435_s8 = inlined_call_operand.vmem [shape: f32[1,128], index: 8, kind: input, shape index: {}]   ;;  %s4436_s9 = inlined_call_operand.hbm [shape: f32[1,2,128], index: 9, kind: output, shape index: {}]  }
   0x1   :  { %v3113_v0 = vld [vmem:[%s4428_s1 + $0x4] ss:$8 sps:$4 sm:$0xff]   ;;  %v3115_v1 = vld [vmem:[%s4428_s1] ss:$8 sps:$4 sm:$0xff]   ;;  %145 = vmatprep.mubr.bf16.mxu0 %v3452_v2  ;;  %214 = vmatprep.mubr.bf16.mxu1 %v3452_v2  ;;  %v3119_v8 = vld [vmem:[%s4428_s1 + $0x10] ss:$8 sps:$4 sm:$0xff]  }
   0x2   :  { %113 = vmatprep.subr.bf16.mxu0 %v3113_v0  ;;  %v3116_v3 = vld [vmem:[%s4428_s1 + $0x24] ss:$8 sps:$4 sm:$0xff]   ;;  %v3118_v4 = vld [vmem:[%s4428_s1 + $0x20] ss:$8 sps:$4 sm:$0xff]   ;;  %v3121_v9 = vld [vmem:[%s4428_s1 + $0x14] ss:$8 sps:$4 sm:$0xff]  }
   0x3   :  { %v87_v5 = vld [vmem:[%s4427_s0] sm:$0xff]  ;;  %114 = vmatpush1.bf16.msra.mxu0 %v3115_v1  ;;  %v88_v6 = vld [vmem:[%s4427_s0 + $0x8] sm:$0xff]  ;;  %182 = vmatprep.subr.bf16.mxu1 %v3116_v3  ;;  %v89_v10 = vld [vmem:[%s4427_s0 + $0x10] sm:$0xff] }
   0x4   :  { %v92_v7 = vpack.c.bf16 %v88_v6, %v87_v5  ;;  %183 = vmatpush1.bf16.msra.mxu1 %v3118_v4  ;;  %v90_v11 = vld [vmem:[%s4427_s0 + $0x18] sm:$0xff]  ;;  %351 = vmatprep.subr.bf16.mxu0 %v3121_v9 }
   0x5   :  { %v93_v12 = vpack.c.bf16 %v90_v11, %v89_v10 }
   0x6   :  { %2696 = vmatmul.mubr.msk.bf16.vlgmr.msra.gmra.mrb[0].mxu0 %vm106_vm0, %v92_v7 }
   0x7   :  { %352 = vmatpush1.bf16.msra.mxu0 %v3119_v8  ;;  %155 = vmatprep.mubr.bf16.mxu0 %v3452_v2 }
   0x8   :  { %2704 = vmatmul.mubr.msk.bf16.vlgmr.msra.gmra.mrb[0].mxu1 %vm106_vm0, %v92_v7 }
   0x9   :  { %224 = vmatprep.mubr.bf16.mxu1 %v3452_v2 }
   0xe   :  { %2697 = vmatmul.mubr.msk.bf16.gmra.mrb[4].mxu0 %vm106_vm0, %v93_v12 }
   0xf   :  { %383 = vmatprep.mubr.bf16.mxu0 %v3452_v2 }
  0x10   :  { %2705 = vmatmul.mubr.msk.bf16.gmra.mrb[4].mxu1 %vm106_vm0, %v93_v12 }
  0x16   :  { %2708 = vmatmul.mubr.msk.bf16.vlgmr.msra.gmra.mrb[8].mxu0 %vm106_vm0, %v92_v7 }
  0x17   :  { %393 = vmatprep.mubr.bf16.mxu0 %v3452_v2 }
  0x1e   :  { %2709 = vmatmul.mubr.msk.bf16.gmra.mrb[12].mxu0 %vm106_vm0, %v93_v12 }
  0x1f   :  { %14 = vsyncpa [#allocation3], 0  ;;  %v3122_v13 = vld [vmem:[%s4430_s3] ss:$8 sps:$4 sm:$0xff]   ;;  %v3124_v14 = vld [vmem:[%s4430_s3 + $0x4] ss:$8 sps:$4 sm:$0xff]   ;;  %v34_v61 = vlaneseq }
  0x20   :  { %v3125_v15 = vld [vmem:[%s4430_s3 + $0x200] ss:$8 sps:$4 sm:$0xff]   ;;  %v3127_v16 = vld [vmem:[%s4430_s3 + $0x204] ss:$8 sps:$4 sm:$0xff]   ;;  %v3130_v17 = vld [vmem:[%s4430_s3 + $0x14] ss:$8 sps:$4 sm:$0xff]   ;;  %725 = vmatprep.subr.bf16.mxu1 %v3124_v14 }
  0x21   :  { %v3133_v18 = vld [vmem:[%s4430_s3 + $0x214] ss:$8 sps:$4 sm:$0xff]   ;;  %726 = vmatpush1.bf16.msra.mxu1 %v3122_v13  ;;  %1004 = vmatprep.subr.bf16.mxu0 %v3127_v16  ;;  %v3128_v19 = vld [vmem:[%s4430_s3 + $0x10] ss:$8 sps:$4 sm:$0xff]   ;;  %v3136_v21 = vld [vmem:[%s4430_s3 + $0x24] ss:$8 sps:$4 sm:$0xff]  }
  0x22   :  { %1005 = vmatpush1.bf16.msra.mxu0 %v3125_v15  ;;  %727 = vmatprep.subr.bf16.mxu1 %v3130_v17  ;;  %v3131_v20 = vld [vmem:[%s4430_s3 + $0x210] ss:$8 sps:$4 sm:$0xff]   ;;  %v3139_v22 = vld [vmem:[%s4430_s3 + $0x224] ss:$8 sps:$4 sm:$0xff]   ;;  %v3134_v23 = vld [vmem:[%s4430_s3 + $0x20] ss:$8 sps:$4 sm:$0xff]  }
  0x23   :  { %1006 = vmatprep.subr.bf16.mxu0 %v3133_v18  ;;  %v3137_v24 = vld [vmem:[%s4430_s3 + $0x220] ss:$8 sps:$4 sm:$0xff]   ;;  %v3142_v25 = vld [vmem:[%s4430_s3 + $0x34] ss:$8 sps:$4 sm:$0xff]   ;;  %v3140_v27 = vld [vmem:[%s4430_s3 + $0x30] ss:$8 sps:$4 sm:$0xff]  }
  0x24   :  { %v3145_v26 = vld [vmem:[%s4430_s3 + $0x234] ss:$8 sps:$4 sm:$0xff]   ;;  %v3143_v28 = vld [vmem:[%s4430_s3 + $0x230] ss:$8 sps:$4 sm:$0xff]   ;;  %v3148_v29 = vld [vmem:[%s4430_s3 + $0x44] ss:$8 sps:$4 sm:$0xff]  }
  0x25   :  { %728 = vmatpush1.bf16.msra.mxu1 %v3128_v19  ;;  %v3151_v30 = vld [vmem:[%s4430_s3 + $0x244] ss:$8 sps:$4 sm:$0xff]   ;;  %v3146_v31 = vld [vmem:[%s4430_s3 + $0x40] ss:$8 sps:$4 sm:$0xff]   ;;  %v3154_v33 = vld [vmem:[%s4430_s3 + $0x54] ss:$8 sps:$4 sm:$0xff]  }
  0x26   :  { %1007 = vmatpush1.bf16.msra.mxu0 %v3131_v20  ;;  %729 = vmatprep.subr.bf16.mxu1 %v3136_v21  ;;  %v3149_v32 = vld [vmem:[%s4430_s3 + $0x240] ss:$8 sps:$4 sm:$0xff]   ;;  %v3157_v34 = vld [vmem:[%s4430_s3 + $0x254] ss:$8 sps:$4 sm:$0xff]   ;;  %v3152_v35 = vld [vmem:[%s4430_s3 + $0x50] ss:$8 sps:$4 sm:$0xff]  }
  0x27   :  { %1008 = vmatprep.subr.bf16.mxu0 %v3139_v22  ;;  %v3155_v36 = vld [vmem:[%s4430_s3 + $0x250] ss:$8 sps:$4 sm:$0xff]   ;;  %v3160_v37 = vld [vmem:[%s4430_s3 + $0x64] ss:$8 sps:$4 sm:$0xff]   ;;  %v3158_v39 = vld [vmem:[%s4430_s3 + $0x60] ss:$8 sps:$4 sm:$0xff]  }
  0x28   :  { %v3163_v38 = vld [vmem:[%s4430_s3 + $0x264] ss:$8 sps:$4 sm:$0xff]   ;;  %v3161_v40 = vld [vmem:[%s4430_s3 + $0x260] ss:$8 sps:$4 sm:$0xff]   ;;  %v3166_v41 = vld [vmem:[%s4430_s3 + $0x74] ss:$8 sps:$4 sm:$0xff]  }
  0x29   :  { %730 = vmatpush1.bf16.msra.mxu1 %v3134_v23  ;;  %v3169_v42 = vld [vmem:[%s4430_s3 + $0x274] ss:$8 sps:$4 sm:$0xff]   ;;  %v3164_v43 = vld [vmem:[%s4430_s3 + $0x70] ss:$8 sps:$4 sm:$0xff]   ;;  %v3172_v45 = vld [vmem:[%s4430_s3 + $0x84] ss:$8 sps:$4 sm:$0xff]  }
  0x2a   :  { %1009 = vmatpush1.bf16.msra.mxu0 %v3137_v24  ;;  %731 = vmatprep.subr.bf16.mxu1 %v3142_v25  ;;  %v3167_v44 = vld [vmem:[%s4430_s3 + $0x270] ss:$8 sps:$4 sm:$0xff]   ;;  %v3175_v46 = vld [vmem:[%s4430_s3 + $0x284] ss:$8 sps:$4 sm:$0xff]   ;;  %v3170_v47 = vld [vmem:[%s4430_s3 + $0x80] ss:$8 sps:$4 sm:$0xff]  }
  0x2b   :  { %1010 = vmatprep.subr.bf16.mxu0 %v3145_v26  ;;  %v3173_v48 = vld [vmem:[%s4430_s3 + $0x280] ss:$8 sps:$4 sm:$0xff]   ;;  %v3178_v49 = vld [vmem:[%s4430_s3 + $0x94] ss:$8 sps:$4 sm:$0xff]   ;;  %v3176_v51 = vld [vmem:[%s4430_s3 + $0x90] ss:$8 sps:$4 sm:$0xff]  }
  0x2c   :  { %v3181_v50 = vld [vmem:[%s4430_s3 + $0x294] ss:$8 sps:$4 sm:$0xff]   ;;  %v3179_v52 = vld [vmem:[%s4430_s3 + $0x290] ss:$8 sps:$4 sm:$0xff]   ;;  %v3184_v53 = vld [vmem:[%s4430_s3 + $0xa4] ss:$8 sps:$4 sm:$0xff]  }
  0x2d   :  { %732 = vmatpush1.bf16.msra.mxu1 %v3140_v27  ;;  %v3187_v54 = vld [vmem:[%s4430_s3 + $0x2a4] ss:$8 sps:$4 sm:$0xff]   ;;  %v3182_v55 = vld [vmem:[%s4430_s3 + $0xa0] ss:$8 sps:$4 sm:$0xff]   ;;  %v3190_v57 = vld [vmem:[%s4430_s3 + $0xb4] ss:$8 sps:$4 sm:$0xff]  }
  0x2e   :  { %1011 = vmatpush1.bf16.msra.mxu0 %v3143_v28  ;;  %733 = vmatprep.subr.bf16.mxu1 %v3148_v29  ;;  %v3185_v56 = vld [vmem:[%s4430_s3 + $0x2a0] ss:$8 sps:$4 sm:$0xff]   ;;  %v3193_v58 = vld [vmem:[%s4430_s3 + $0x2b4] ss:$8 sps:$4 sm:$0xff]   ;;  %v3188_v59 = vld [vmem:[%s4430_s3 + $0xb0] ss:$8 sps:$4 sm:$0xff]  }
  0x2f   :  { %1012 = vmatprep.subr.bf16.mxu0 %v3151_v30  ;;  %v3191_v60 = vld [vmem:[%s4430_s3 + $0x2b0] ss:$8 sps:$4 sm:$0xff]   ;;  %v3686_v2 = vshrl.u32 %v34_v61, 7  ;;  %vm247_vm1 = vcmask 1040384   ;;  %vm300_vm2 = vcmask 1046528   ;;  %vm463_vm7 = vcmask 916480  }
  0x30   :  { %v3196_v61 = vld [vmem:[%s4430_s3 + $0xc4] ss:$8 sps:$4 sm:$0xff]   ;;  %vm1122_vm8 = vcmask 1045504   ;;  %vm1069_vm9 = vcmask 1041408   ;;  %s3454_s30 = smov 96   ;;  %vm1435_vm14 = vcmask 785408  }
  0x31   :  { %734 = vmatpush1.bf16.msra.mxu1 %v3146_v31  ;;  %v3690_v16 = vand.u32 15, %v3686_v2  ;;  %v36_v19 = vadd.s32 8, %v3686_v2  ;;  %v37_v27 = vadd.s32 16, %v3686_v2  ;;  %vm2041_vm15 = vcmask 1043456   ;;  %s3455_s10 = smov [#allocation2]  }
  0x32   :  { %1013 = vmatpush1.bf16.msra.mxu0 %v3149_v32  ;;  %735 = vmatprep.subr.bf16.mxu1 %v3154_v33  ;;  %s2686_s11 = sshll.u32 %s3455_s10, 4  ;;  %s2687_s11 = int_to_ptr.vmem [resolvable:$true] %s2686_s11 }
  0x33   :  { %1014 = vmatprep.subr.bf16.mxu0 %v3157_v34  ;;  %vm235_vm3 = vcmp.ge.s32.totalorder %v3690_v16, 1  ;;  %v3698_v32 = vand.u32 15, %v36_v19  ;;  %vm1057_vm10 = vcmp.ge.s32.totalorder %v3690_v16, 2  ;;  %vm2029_vm0 = vcmp.ge.s32.totalorder %v3690_v16, 4  ;;  %p3433_p1 = scmp.lt.s32.totalorder %s2687_s11, %s2687_s11 }
  0x35   :  { %736 = vmatpush1.bf16.msra.mxu1 %v3152_v35  ;;  %vm289_vm4 = vcmp.lt.s32.totalorder %v3698_v32, 15  ;;  %vm1111_vm11 = vcmp.lt.s32.totalorder %v3698_v32, 14 }
  0x36   :  { %1015 = vmatpush1.bf16.msra.mxu0 %v3155_v36  ;;  %737 = vmatprep.subr.bf16.mxu1 %v3160_v37 }
  0x37   :  { %1016 = vmatprep.subr.bf16.mxu0 %v3163_v38  ;;  %v3703_v38 = vsub.s32 1, %v3686_v2 }
  0x39   :  { %738 = vmatpush1.bf16.msra.mxu1 %v3158_v39 }
  0x3a   :  { %1017 = vmatpush1.bf16.msra.mxu0 %v3161_v40  ;;  %739 = vmatprep.subr.bf16.mxu1 %v3166_v41 }
  0x3b   :  { %1018 = vmatprep.subr.bf16.mxu0 %v3169_v42 }
  0x3d   :  { %740 = vmatpush1.bf16.msra.mxu1 %v3164_v43 }
  0x3e   :  { %1019 = vmatpush1.bf16.msra.mxu0 %v3167_v44  ;;  %741 = vmatprep.subr.bf16.mxu1 %v3172_v45 }
  0x3f   :  { %1020 = vmatprep.subr.bf16.mxu0 %v3175_v46 }
  0x41   :  { %742 = vmatpush1.bf16.msra.mxu1 %v3170_v47 }
  0x42   :  { %1021 = vmatpush1.bf16.msra.mxu0 %v3173_v48  ;;  %743 = vmatprep.subr.bf16.mxu1 %v3178_v49  ;;  %v91_v48 = vld [vmem:[%s4429_s2] sm:$0x3]  ;;  %s3453_s2 = smov 112  }
  0x43   :  { %1022 = vmatprep.subr.bf16.mxu0 %v3181_v50 }
  0x45   :  { %744 = vmatpush1.bf16.msra.mxu1 %v3176_v51 }
  0x46   :  { %1023 = vmatpush1.bf16.msra.mxu0 %v3179_v52  ;;  %745 = vmatprep.subr.bf16.mxu1 %v3184_v53  ;;  %v38_v53 = vadd.s32 24, %v3686_v2 }
  0x47   :  { %1024 = vmatprep.subr.bf16.mxu0 %v3187_v54 }
  0x49   :  { %746 = vmatpush1.bf16.msra.mxu1 %v3182_v55 }
  0x4a   :  { %1025 = vmatpush1.bf16.msra.mxu0 %v3185_v56  ;;  %747 = vmatprep.subr.bf16.mxu1 %v3190_v57  ;;  %v3726_v57 = vand.u32 15, %v37_v27 }
  0x4b   :  { %1026 = vmatprep.subr.bf16.mxu0 %v3193_v58 }
  0x4c   :  { %vm237_vm5 = vcmp.ge.s32.totalorder %v3726_v57, 1  ;;  %vm1059_vm12 = vcmp.ge.s32.totalorder %v3726_v57, 2 }
  0x4d   :  { %748 = vmatpush1.bf16.msra.mxu1 %v3188_v59 }
  0x4e   :  { %1027 = vmatpush1.bf16.msra.mxu0 %v3191_v60  ;;  %v3729_v60 = vrot.slane %v91_v48, %v3703_v38  ;;  %749 = vmatprep.subr.bf16.mxu1 %v3196_v61 }
  0xd9   :  { %v147_v62 = vpop.f32.mrb[0].mxu0 }
  0xda   :  { %v149_v63 = vpop.f32.mrb[1].mxu0  ;;  %v248_v3 = vrot.slane %v147_v62, 7 }
  0xdb   :  { %v151_v0 = vpop.f32.mrb[2].mxu0  ;;  %v216_v1 = vpop.f32.mrb[0].mxu1  ;;  %v249_v8 = vrot.slane %v149_v63, 7  ;;  %v3735_v63 = vsub.s32 0, %v3686_v2  ;;  %v3197_v2 = vld [vmem:[%s4430_s3 + $0x2c0] ss:$8 sps:$4 sm:$0xff]  }
  0xdc   :  { %v250_v4 = vrot.slane %v151_v0, 7  ;;  %v153_v5 = vpop.f32.mrb[3].mxu0  ;;  %v301_v6 = vrot.slane %v216_v1, 1  ;;  %v218_v7 = vpop.f32.mrb[1].mxu1  ;;  %v270_v39 = vsel %vm247_vm1, 0.0, %v248_v3 }
  0xdd   :  { %v252_v9 = vrot.slane %v153_v5, 7  ;;  %v304_v10 = vrot.slane %v218_v7, 1  ;;  %v220_v11 = vpop.f32.mrb[2].mxu1  ;;  %v271_v44 = vsel %vm247_vm1, 0.0, %v249_v8  ;;  %v280_v50 = vsel %vm235_vm3, %v270_v39, 0.0 }
  0xde   :  { %v302_v12 = vrot.slane %v220_v11, 1  ;;  %v222_v13 = vpop.f32.mrb[3].mxu1  ;;  %v251_v14 = vsel %vm247_vm1, %v248_v3, %v250_v4  ;;  %v281_v55 = vsel %vm235_vm3, %v271_v44, 0.0  ;;  %v3194_v3 = vld [vmem:[%s4430_s3 + $0xc0] ss:$8 sps:$4 sm:$0xff]  }
  0xdf   :  { %v305_v15 = vrot.slane %v222_v13, 1  ;;  %v253_v17 = vsel %vm247_vm1, %v249_v8, %v252_v9  ;;  %v3745_v8 = vand.u32 15, %v38_v53  ;;  %750 = vmatpush1.bf16.msra.mxu1 %v3194_v3  ;;  %v3202_v13 = vld [vmem:[%s4430_s3 + $0xd4] ss:$8 sps:$4 sm:$0xff]   ;;  %v3206_v39 = vld [vmem:[%s4430_s3 + $0xe0] ss:$8 sps:$4 sm:$0xff]  }
  0xe0   :  { %v303_v18 = vsel %vm300_vm2, %v301_v6, %v302_v12  ;;  %751 = vmatprep.subr.bf16.mxu1 %v3202_v13 }
  0xe1   :  { %v157_v20 = vpop.f32.mrb[4].mxu0  ;;  %v306_v21 = vsel %vm300_vm2, %v304_v10, %v305_v15  ;;  %vm291_vm6 = vcmp.lt.s32.totalorder %v3745_v8, 15  ;;  %vm1113_vm13 = vcmp.lt.s32.totalorder %v3745_v8, 14  ;;  %vm2085_vm3 = vcmp.lt.s32.totalorder %v3745_v8, 12 }
  0xe2   :  { %v254_v22 = vrot.slane %v157_v20, 7  ;;  %v159_v23 = vpop.f32.mrb[5].mxu0 }
  0xe3   :  { %v256_v24 = vrot.slane %v159_v23, 7  ;;  %v161_v25 = vpop.f32.mrb[6].mxu0  ;;  %v226_v26 = vpop.f32.mrb[4].mxu1 }
  0xe4   :  { %v258_v28 = vrot.slane %v161_v25, 7  ;;  %v307_v29 = vrot.slane %v226_v26, 1  ;;  %v163_v30 = vpop.f32.mrb[7].mxu0  ;;  %v228_v31 = vpop.f32.mrb[5].mxu1  ;;  %v255_v33 = vsel %vm247_vm1, %v250_v4, %v254_v22  ;;  %v3199_v4 = vld [vmem:[%s4430_s3 + $0x2c4] ss:$8 sps:$4 sm:$0xff]  }
  0xe5   :  { %v260_v34 = vrot.slane %v163_v30, 7  ;;  %v309_v35 = vrot.slane %v228_v31, 1  ;;  %v230_v36 = vpop.f32.mrb[6].mxu1  ;;  %v257_v37 = vsel %vm247_vm1, %v252_v9, %v256_v24  ;;  %1028 = vmatprep.subr.bf16.mxu0 %v3199_v4  ;;  %v284_v19 = vsel %vm237_vm5, %v255_v33, 0.0  ;;  %v3208_v31 = vld [vmem:[%s4430_s3 + $0xe4] ss:$8 sps:$4 sm:$0xff]  }
  0xe6   :  { %v311_v40 = vrot.slane %v230_v36, 1  ;;  %v308_v41 = vsel %vm300_vm2, %v302_v12, %v307_v29  ;;  %v232_v42 = vpop.f32.mrb[7].mxu1  ;;  %v3708_v43 = vsel %vm247_vm1, %v254_v22, %v258_v28  ;;  %1029 = vmatpush1.bf16.msra.mxu0 %v3197_v2  ;;  %v3203_v22 = vld [vmem:[%s4430_s3 + $0x2d0] ss:$8 sps:$4 sm:$0xff]  }
  0xe7   :  { %v313_v45 = vrot.slane %v232_v42, 1  ;;  %v310_v46 = vsel %vm300_vm2, %v305_v15, %v309_v35  ;;  %v3713_v47 = vsel %vm247_vm1, %v256_v24, %v260_v34  ;;  %v335_v6 = vsel %vm289_vm4, %v308_v41, 0.0  ;;  %v3200_v15 = vld [vmem:[%s4430_s3 + $0xd0] ss:$8 sps:$4 sm:$0xff]  }
  0xe8   :  { %v312_v49 = vsel %vm300_vm2, %v307_v29, %v311_v40  ;;  %v336_v10 = vsel %vm289_vm4, %v310_v46, 0.0  ;;  %v285_v24 = vsel %vm237_vm5, %v257_v37, 0.0  ;;  %752 = vmatpush1.bf16.msra.mxu1 %v3200_v15  ;;  %vm2083_vm1 = vcmp.lt.s32.totalorder %v3698_v32, 12 }
  0xe9   :  { %v385_v51 = vpop.f32.mrb[8].mxu0  ;;  %v314_v52 = vsel %vm300_vm2, %v309_v35, %v313_v45  ;;  %v324_v26 = vsel %vm300_vm2, %v313_v45, 0.0  ;;  %753 = vmatprep.subr.bf16.mxu1 %v3208_v31 }
  0xea   :  { %v386_v54 = vadd.f32 %v385_v51, %v280_v50  ;;  %v387_v56 = vpop.f32.mrb[9].mxu0 }
  0xeb   :  { %v388_v58 = vadd.f32 %v387_v56, %v281_v55  ;;  %v389_v59 = vpop.f32.mrb[10].mxu0  ;;  %v3212_v55 = vld [vmem:[%s4430_s3 + $0xf0] ss:$8 sps:$4 sm:$0xff]   ;;  %v3217_v56 = vld [vmem:[%s4430_s3 + $0x2f4] ss:$8 sps:$4 sm:$0xff]  }
  0xec   :  { %v404_v62 = vadd.f32 %v386_v54, %v303_v18  ;;  %v390_v0 = vadd.f32 %v389_v59, %v251_v14  ;;  %v391_v1 = vpop.f32.mrb[11].mxu0  ;;  %v416_v14 = vrot.slane %v91_v48, %v3735_v63  ;;  %v323_v18 = vsel %vm300_vm2, %v311_v40, 0.0  ;;  %v3211_v40 = vld [vmem:[%s4430_s3 + $0x2e4] ss:$8 sps:$4 sm:$0xff]   ;;  %754 = vmatpush1.bf16.msra.mxu1 %v3206_v39 }
  0xed   :  { %v405_v5 = vadd.f32 %v388_v58, %v306_v21  ;;  %v392_v7 = vadd.f32 %v391_v1, %v253_v17  ;;  %v3205_v17 = vld [vmem:[%s4430_s3 + $0x2d4] ss:$8 sps:$4 sm:$0xff]   ;;  %v339_v34 = vsel %vm291_vm6, %v323_v18, 0.0  ;;  %v340_v48 = vsel %vm291_vm6, %v324_v26, 0.0 }
  0xee   :  { %v406_v9 = vadd.f32 %v390_v0, %v335_v6  ;;  %1030 = vmatprep.subr.bf16.mxu0 %v3205_v17  ;;  %v3793_v41 = vadd.f32 %v416_v14, %v404_v62  ;;  %v3215_v62 = vld [vmem:[%s4430_s3 + $0x2f0] ss:$8 sps:$4 sm:$0xff]  }
  0xef   :  { %v407_v11 = vadd.f32 %v392_v7, %v336_v10  ;;  %v3754_v12 = vadd.f32 %v3729_v60, %v405_v5  ;;  %1031 = vmatpush1.bf16.msra.mxu0 %v3203_v22  ;;  %v3220_v5 = vld [vmem:[%s4430_s3 + $0x104] ss:$8 sps:$4 sm:$0xff]  }
  0xf0   :  { %v425_v37 = vadd.f32 %v416_v14, %v406_v9  ;;  %1032 = vmatprep.subr.bf16.mxu0 %v3211_v40  ;;  %v431_v58 = vmax.f32 %v3793_v41, 0.0 }
  0xf1   :  { %v395_v20 = vpop.f32.mrb[12].mxu0  ;;  %v3771_v21 = vadd.f32 %v3729_v60, %v407_v11  ;;  %v432_v29 = vmax.f32 %v3754_v12, 0.0 }
  0xf2   :  { %v396_v23 = vadd.f32 %v395_v20, %v284_v19  ;;  %v397_v25 = vpop.f32.mrb[13].mxu0  ;;  %v433_v53 = vmax.f32 %v425_v37, 0.0 }
  0xf3   :  { %v398_v27 = vadd.f32 %v397_v25, %v285_v24  ;;  %v399_v28 = vpop.f32.mrb[14].mxu0  ;;  %v434_v30 = vmax.f32 %v3771_v21, 0.0 }
  0xf4   :  { %v408_v33 = vadd.f32 %v396_v23, %v312_v49  ;;  %v400_v35 = vadd.f32 %v399_v28, %v3708_v43  ;;  %v401_v36 = vpop.f32.mrb[15].mxu0  ;;  %v3209_v43 = vld [vmem:[%s4430_s3 + $0x2e0] ss:$8 sps:$4 sm:$0xff]  }
  0xf5   :  { %v409_v42 = vadd.f32 %v398_v27, %v314_v52  ;;  %v402_v44 = vadd.f32 %v401_v36, %v3713_v47  ;;  %v3073_v45 = vpack.i.bf16 %v434_v30, %v432_v29  ;;  %1033 = vmatpush1.bf16.msra.mxu0 %v3209_v43  ;;  %v3214_v47 = vld [vmem:[%s4430_s3 + $0xf4] ss:$8 sps:$4 sm:$0xff]  }
  0xf6   :  { %v410_v46 = vadd.f32 %v400_v35, %v339_v34  ;;  %v427_v49 = vadd.f32 %v416_v14, %v408_v33  ;;  %755 = vmatprep.subr.bf16.mxu1 %v3214_v47  ;;  %1034 = vmatprep.subr.bf16.mxu0 %v3217_v56 }
  0xf7   :  { %v428_v50 = vadd.f32 %v3729_v60, %v409_v42  ;;  %v411_v51 = vadd.f32 %v402_v44, %v340_v48  ;;  %3074 = vrot.lane.b32.xlu0 %v3073_v45, %s3453_s2  ;;  %756 = vmatpush1.bf16.msra.mxu1 %v3212_v55  ;;  %v3218_v55 = vld [vmem:[%s4430_s3 + $0x100] ss:$8 sps:$4 sm:$0xff]  }
  0xf8   :  { %v429_v52 = vadd.f32 %v416_v14, %v410_v46  ;;  %v435_v54 = vmax.f32 %v427_v49, 0.0  ;;  %1323 = vmatprep.subr.bf16.mxu1 %v3220_v5  ;;  %v3226_v5 = vld [vmem:[%s4430_s3 + $0x124] ss:$8 sps:$4 sm:$0xff]  }
  0xf9   :  { %v436_v59 = vmax.f32 %v428_v50, 0.0  ;;  %v430_v61 = vadd.f32 %v3729_v60, %v411_v51  ;;  %1035 = vmatpush1.bf16.msra.mxu0 %v3215_v62  ;;  %v3223_v62 = vld [vmem:[%s4430_s3 + $0x114] ss:$8 sps:$4 sm:$0xff]  }
  0xfa   :  { %v437_v0 = vmax.f32 %v429_v52, 0.0  ;;  %v3083_v1 = vpack.i.bf16 %v435_v54, %v433_v53 }
  0xfb   :  { %v438_v3 = vmax.f32 %v430_v61, 0.0  ;;  %v3078_v4 = vpack.i.bf16 %v431_v58, %v436_v59 }
  0xfc   :  { %3084 = vrot.lane.b32.xlu1 %v3083_v1, %s3453_s2 }
  0xfd   :  { %3079 = vrot.lane.b32.xlu0 %v3078_v4, %s3453_s2  ;;  %v3088_v6 = vpack.i.bf16 %v437_v0, %v438_v3  ;;  %v3221_v4 = vld [vmem:[%s4430_s3 + $0x110] ss:$8 sps:$4 sm:$0xff]  }
 0x100   :  { %3089 = vrot.lane.b32.xlu1 %v3088_v6, %s3453_s2  ;;  %s3428_s2 = scalar_lea.vmem %s2687_s11, 32 }
 0x101   :  { %p3429_p0 = scmp.ne.s32.totalorder %s2687_s11, %s3428_s2  ;;  %p3434_p2 = scmp.lt.s32.totalorder %s3428_s2, %s3428_s2 }
 0x103   :  { %p3435_p3 = por %p3434_p2, %p3433_p1 }
 0x105   :  { %p3436_p4 = pnand %p3435_p3, %p3429_p0 }
 0x169   :  { %v3075_v60 = vpop.permute.xlu0 %3074 }
 0x16a   :  { %v3077_v7 = vunpack.i.h.bf16 %v3075_v60  ;;  %v3076_v2 = vunpack.i.l.bf16 %v3075_v60 }
 0x16c   :  { %v477_v9 = vsel %vm463_vm7, %v3077_v7, 0.0  ;;  %v476_v10 = vsel %vm463_vm7, %v3076_v2, 0.0 }
 0x16d   :  { %v483_v11 = vmax.f32 %v434_v30, %v477_v9  ;;  %v481_v12 = vmax.f32 %v432_v29, %v476_v10  ;;  %v3229_v9 = vld [vmem:[%s4430_s3 + $0x134] ss:$8 sps:$4 sm:$0xff]   ;;  %v3227_v10 = vld [vmem:[%s4430_s3 + $0x130] ss:$8 sps:$4 sm:$0xff]  }
 0x16e   :  { %v3085_v13 = vpop.permute.xlu1 %3084 }
 0x16f   :  { %v3087_v14 = vunpack.i.h.bf16 %v3085_v13  ;;  %v3086_v15 = vunpack.i.l.bf16 %v3085_v13  ;;  %v3080_v17 = vpop.permute.xlu0 %3079  ;;  %v500_v20 = vrot.slane %v483_v11, 1  ;;  %v499_v21 = vrot.slane %v481_v12, 1  ;;  %v3235_v13 = vld [vmem:[%s4430_s3 + $0x154] ss:$8 sps:$4 sm:$0xff]  }
 0x170   :  { %v3082_v18 = vunpack.i.h.bf16 %v3080_v17  ;;  %v3081_v19 = vunpack.i.l.bf16 %v3080_v17  ;;  %v3236_v17 = vld [vmem:[%s4430_s3 + $0x160] ss:$8 sps:$4 sm:$0xff]  }
 0x171   :  { %v465_v22 = vsel %vm463_vm7, %v3086_v15, %v3077_v7  ;;  %v501_v41 = vsel %vm300_vm2, %v499_v21, %v500_v20  ;;  %v3224_v7 = vld [vmem:[%s4430_s3 + $0x120] ss:$8 sps:$4 sm:$0xff]   ;;  %v3238_v15 = vld [vmem:[%s4430_s3 + $0x164] ss:$8 sps:$4 sm:$0xff]  }
 0x172   :  { %v482_v23 = vmax.f32 %v433_v53, %v465_v22  ;;  %v464_v24 = vsel %vm463_vm7, %v3082_v18, %v3076_v2  ;;  %v466_v25 = vsel %vm463_vm7, %v3087_v14, %v3081_v19  ;;  %v478_v26 = vsel %vm463_vm7, %v3081_v19, 0.0  ;;  %v3090_v27 = vpop.permute.xlu1 %3089  ;;  %v3233_v14 = vld [vmem:[%s4430_s3 + $0x150] ss:$8 sps:$4 sm:$0xff]   ;;  %v3241_v18 = vld [vmem:[%s4430_s3 + $0x174] ss:$8 sps:$4 sm:$0xff]  }
 0x173   :  { %v480_v28 = vmax.f32 %v431_v58, %v464_v24  ;;  %v484_v29 = vmax.f32 %v435_v54, %v466_v25  ;;  %v485_v30 = vmax.f32 %v436_v59, %v478_v26  ;;  %v3092_v31 = vunpack.i.h.bf16 %v3090_v27  ;;  %v3239_v19 = vld [vmem:[%s4430_s3 + $0x170] ss:$8 sps:$4 sm:$0xff]   ;;  %v3242_v21 = vld [vmem:[%s4430_s3 + $0x180] ss:$8 sps:$4 sm:$0xff]   ;;  %v3247_v22 = vld [vmem:[%s4430_s3 + $0x194] ss:$8 sps:$4 sm:$0xff]  }
 0x174   :  { %v497_v33 = vrot.slane %v482_v23, 1  ;;  %v3091_v34 = vunpack.i.l.bf16 %v3090_v27  ;;  %v521_v51 = vmax.f32 %v481_v12, %v501_v41  ;;  %v3230_v12 = vld [vmem:[%s4430_s3 + $0x140] ss:$8 sps:$4 sm:$0xff]   ;;  %v3250_v24 = vld [vmem:[%s4430_s3 + $0x1a4] ss:$8 sps:$4 sm:$0xff]  }
 0x175   :  { %v496_v35 = vrot.slane %v480_v28, 1  ;;  %v502_v36 = vrot.slane %v484_v29, 1  ;;  %v504_v37 = vrot.slane %v485_v30, 1  ;;  %v3248_v25 = vld [vmem:[%s4430_s3 + $0x1a0] ss:$8 sps:$4 sm:$0xff]  }
 0x176   :  { %v467_v39 = vsel %vm463_vm7, %v3092_v31, %v3091_v34  ;;  %v479_v40 = vsel %vm463_vm7, %v3091_v34, 0.0  ;;  %v3253_v26 = vld [vmem:[%s4430_s3 + $0x1b4] ss:$8 sps:$4 sm:$0xff]   ;;  %v3251_v27 = vld [vmem:[%s4430_s3 + $0x1b0] ss:$8 sps:$4 sm:$0xff]  }
 0x177   :  { %v498_v42 = vsel %vm300_vm2, %v496_v35, %v497_v33  ;;  %v503_v44 = vsel %vm300_vm2, %v497_v33, %v502_v36  ;;  %v486_v45 = vmax.f32 %v437_v0, %v467_v39  ;;  %v487_v43 = vmax.f32 %v438_v3, %v479_v40  ;;  %v3257_v31 = vld [vmem:[%s4430_s3 + $0x1d0] ss:$8 sps:$4 sm:$0xff]   ;;  %v3262_v33 = vld [vmem:[%s4430_s3 + $0x1e4] ss:$8 sps:$4 sm:$0xff]   ;;  %v3260_v34 = vld [vmem:[%s4430_s3 + $0x1e0] ss:$8 sps:$4 sm:$0xff]  }
 0x178   :  { %v520_v46 = vmax.f32 %v480_v28, %v498_v42  ;;  %v522_v48 = vmax.f32 %v482_v23, %v503_v44  ;;  %v505_v49 = vsel %vm300_vm2, %v500_v20, %v504_v37  ;;  %v3244_v20 = vld [vmem:[%s4430_s3 + $0x184] ss:$8 sps:$4 sm:$0xff]   ;;  %v3245_v23 = vld [vmem:[%s4430_s3 + $0x190] ss:$8 sps:$4 sm:$0xff]   ;;  %v3265_v35 = vld [vmem:[%s4430_s3 + $0x1f4] ss:$8 sps:$4 sm:$0xff]  }
 0x179   :  { %v508_v50 = vrot.slane %v487_v43, 1  ;;  %v523_v47 = vmax.f32 %v483_v11, %v505_v49  ;;  %v506_v52 = vrot.slane %v486_v45, 1  ;;  %v3232_v11 = vld [vmem:[%s4430_s3 + $0x144] ss:$8 sps:$4 sm:$0xff]   ;;  %v3269_v40 = vld [vmem:[%s4432_s5 + $0x200] ss:$8 sps:$4 sm:$0xff]  }
 0x17a   :  { %v3831_v53 = vpack.c.bf16 %v522_v48, %v520_v46  ;;  %v3256_v28 = vld [vmem:[%s4430_s3 + $0x1c4] ss:$8 sps:$4 sm:$0xff]   ;;  %v3274_v42 = vld [vmem:[%s4432_s5 + $0x14] ss:$8 sps:$4 sm:$0xff]   ;;  %v3278_v49 = vld [vmem:[%s4432_s5 + $0x20] ss:$8 sps:$4 sm:$0xff]  }
 0x17b   :  { %v530_v54 = vpack.c.bf16 %v523_v47, %v521_v51  ;;  %v509_v56 = vsel %vm300_vm2, %v504_v37, %v508_v50  ;;  %v519_v58 = vsel %vm300_vm2, %v508_v50, 0.0  ;;  %v507_v0 = vsel %vm300_vm2, %v502_v36, %v506_v52  ;;  %v3263_v36 = vld [vmem:[%s4430_s3 + $0x1f0] ss:$8 sps:$4 sm:$0xff]   ;;  %v3266_v37 = vld [vmem:[%s4432_s5] ss:$8 sps:$4 sm:$0xff]  }
 0x17c   :  { %v525_v59 = vmax.f32 %v485_v30, %v509_v56  ;;  %v527_v61 = vmax.f32 %v487_v43, %v519_v58  ;;  %v518_v1 = vsel %vm300_vm2, %v506_v52, 0.0  ;;  %v524_v6 = vmax.f32 %v484_v29, %v507_v0  ;;  %v3254_v29 = vld [vmem:[%s4430_s3 + $0x1c0] ss:$8 sps:$4 sm:$0xff]   ;;  %v3259_v30 = vld [vmem:[%s4430_s3 + $0x1d4] ss:$8 sps:$4 sm:$0xff]  }
 0x17d   :  { %757 = vmatprep.mubr.bf16.mxu1 %v530_v54  ;;  %1036 = vmatprep.mubr.bf16.mxu0 %v530_v54  ;;  %v526_v60 = vmax.f32 %v486_v45, %v518_v1  ;;  %v3268_v39 = vld [vmem:[%s4432_s5 + $0x4] ss:$8 sps:$4 sm:$0xff]   ;;  %v3277_v44 = vld [vmem:[%s4432_s5 + $0x214] ss:$8 sps:$4 sm:$0xff]   ;;  %v3272_v45 = vld [vmem:[%s4432_s5 + $0x10] ss:$8 sps:$4 sm:$0xff]  }
 0x17e   :  { %758 = vmatmul.mubr.bf16.vlgmr.msra.gmra.mrb[8].mxu1 %v3831_v53  ;;  %1037 = vmatmul.mubr.bf16.vlgmr.msra.gmra.mrb[16].mxu0 %v3831_v53  ;;  %v3845_v3 = vpack.c.bf16 %v527_v61, %v525_v59  ;;  %v3271_v41 = vld [vmem:[%s4432_s5 + $0x204] ss:$8 sps:$4 sm:$0xff]   ;;  %v3275_v43 = vld [vmem:[%s4432_s5 + $0x210] ss:$8 sps:$4 sm:$0xff]   ;;  %v3281_v50 = vld [vmem:[%s4432_s5 + $0x220] ss:$8 sps:$4 sm:$0xff]  }
 0x17f   :  { %1324 = vmatpush1.bf16.msra.mxu1 %v3218_v55  ;;  %v531_v2 = vpack.c.bf16 %v526_v60, %v524_v6  ;;  %1697 = vmatprep.subr.bf16.mxu0 %v3268_v39  ;;  %v3280_v46 = vld [vmem:[%s4432_s5 + $0x24] ss:$8 sps:$4 sm:$0xff]   ;;  %v3286_v51 = vld [vmem:[%s4432_s5 + $0x34] ss:$8 sps:$4 sm:$0xff]   ;;  %v3284_v52 = vld [vmem:[%s4432_s5 + $0x30] ss:$8 sps:$4 sm:$0xff]  }
 0x180   :  { %767 = vmatprep.mubr.bf16.mxu1 %v3845_v3  ;;  %1046 = vmatprep.mubr.bf16.mxu0 %v3845_v3  ;;  %v3283_v48 = vld [vmem:[%s4432_s5 + $0x224] ss:$8 sps:$4 sm:$0xff]   ;;  %v3289_v47 = vld [vmem:[%s4432_s5 + $0x234] ss:$8 sps:$4 sm:$0xff]   ;;  %v3290_v56 = vld [vmem:[%s4432_s5 + $0x40] ss:$8 sps:$4 sm:$0xff]  }
 0x181   :  { %1325 = vmatprep.subr.bf16.mxu1 %v3223_v62  ;;  %1698 = vmatpush1.bf16.msra.mxu0 %v3266_v37  ;;  %v3295_v55 = vld [vmem:[%s4432_s5 + $0x244] ss:$8 sps:$4 sm:$0xff]   ;;  %v3293_v58 = vld [vmem:[%s4432_s5 + $0x240] ss:$8 sps:$4 sm:$0xff]   ;;  %v3298_v59 = vld [vmem:[%s4432_s5 + $0x54] ss:$8 sps:$4 sm:$0xff]  }
 0x182   :  { %1699 = vmatprep.subr.bf16.mxu0 %v3274_v42  ;;  %v3301_v61 = vld [vmem:[%s4432_s5 + $0x254] ss:$8 sps:$4 sm:$0xff]   ;;  %v3296_v62 = vld [vmem:[%s4432_s5 + $0x50] ss:$8 sps:$4 sm:$0xff]   ;;  %v3304_v1 = vld [vmem:[%s4432_s5 + $0x64] ss:$8 sps:$4 sm:$0xff]  }
 0x183   :  { %1326 = vmatpush1.bf16.msra.mxu1 %v3221_v4  ;;  %v3299_v0 = vld [vmem:[%s4432_s5 + $0x250] ss:$8 sps:$4 sm:$0xff]   ;;  %v3302_v4 = vld [vmem:[%s4432_s5 + $0x60] ss:$8 sps:$4 sm:$0xff]   ;;  %v3310_v6 = vld [vmem:[%s4432_s5 + $0x74] ss:$8 sps:$4 sm:$0xff]  }
 0x184   :  { %1327 = vmatprep.subr.bf16.mxu1 %v3226_v5  ;;  %v3305_v5 = vld [vmem:[%s4432_s5 + $0x260] ss:$8 sps:$4 sm:$0xff]   ;;  %v3313_v60 = vld [vmem:[%s4432_s5 + $0x274] ss:$8 sps:$4 sm:$0xff]   ;;  %vm2031_vm2 = vcmp.ge.s32.totalorder %v3726_v57, 4 }
 0x185   :  { %1700 = vmatpush1.bf16.msra.mxu0 %v3272_v45 }
 0x186   :  { %768 = vmatmul.mubr.bf16.gmra.mrb[12].mxu1 %v531_v2  ;;  %1047 = vmatmul.mubr.bf16.gmra.mrb[20].mxu0 %v531_v2 }
 0x187   :  { %1328 = vmatpush1.bf16.msra.mxu1 %v3224_v7  ;;  %1355 = vmatprep.mubr.bf16.mxu1 %v530_v54  ;;  %v3292_v54 = vld [vmem:[%s4432_s5 + $0x44] ss:$8 sps:$4 sm:$0xff]   ;;  %v3308_v7 = vld [vmem:[%s4432_s5 + $0x70] ss:$8 sps:$4 sm:$0xff]  }
 0x188   :  { %1329 = vmatprep.subr.bf16.mxu1 %v3229_v9  ;;  %1701 = vmatprep.subr.bf16.mxu0 %v3280_v46  ;;  %v3316_v9 = vld [vmem:[%s4432_s5 + $0x84] ss:$8 sps:$4 sm:$0xff]  }
 0x189   :  { %1702 = vmatpush1.bf16.msra.mxu0 %v3278_v49 }
 0x18a   :  { %1703 = vmatprep.subr.bf16.mxu0 %v3286_v51 }
 0x18b   :  { %1330 = vmatpush1.bf16.msra.mxu1 %v3227_v10  ;;  %v3319_v10 = vld [vmem:[%s4432_s5 + $0x284] ss:$8 sps:$4 sm:$0xff]  }
 0x18c   :  { %1331 = vmatprep.subr.bf16.mxu1 %v3232_v11  ;;  %v3314_v11 = vld [vmem:[%s4432_s5 + $0x80] ss:$8 sps:$4 sm:$0xff]  }
 0x18d   :  { %1704 = vmatpush1.bf16.msra.mxu0 %v3284_v52 }
 0x18e   :  { %1705 = vmatprep.subr.bf16.mxu0 %v3292_v54 }
 0x18f   :  { %1332 = vmatpush1.bf16.msra.mxu1 %v3230_v12  ;;  %v3317_v12 = vld [vmem:[%s4432_s5 + $0x280] ss:$8 sps:$4 sm:$0xff]  }
 0x190   :  { %1333 = vmatprep.subr.bf16.mxu1 %v3235_v13  ;;  %v3322_v13 = vld [vmem:[%s4432_s5 + $0x94] ss:$8 sps:$4 sm:$0xff]  }
 0x191   :  { %1706 = vmatpush1.bf16.msra.mxu0 %v3290_v56 }
 0x192   :  { %1707 = vmatprep.subr.bf16.mxu0 %v3298_v59 }
 0x193   :  { %1334 = vmatpush1.bf16.msra.mxu1 %v3233_v14  ;;  %v3325_v14 = vld [vmem:[%s4432_s5 + $0x294] ss:$8 sps:$4 sm:$0xff]  }
 0x194   :  { %1335 = vmatprep.subr.bf16.mxu1 %v3238_v15  ;;  %v3320_v15 = vld [vmem:[%s4432_s5 + $0x90] ss:$8 sps:$4 sm:$0xff]  }
 0x195   :  { %1708 = vmatpush1.bf16.msra.mxu0 %v3296_v62 }
 0x196   :  { %1709 = vmatprep.subr.bf16.mxu0 %v3304_v1 }
 0x197   :  { %1336 = vmatpush1.bf16.msra.mxu1 %v3236_v17  ;;  %v3323_v17 = vld [vmem:[%s4432_s5 + $0x290] ss:$8 sps:$4 sm:$0xff]  }
 0x198   :  { %1337 = vmatprep.subr.bf16.mxu1 %v3241_v18  ;;  %v3328_v18 = vld [vmem:[%s4432_s5 + $0xa4] ss:$8 sps:$4 sm:$0xff]  }
 0x199   :  { %1710 = vmatpush1.bf16.msra.mxu0 %v3302_v4 }
 0x19a   :  { %1711 = vmatprep.subr.bf16.mxu0 %v3310_v6 }
 0x19b   :  { %1338 = vmatpush1.bf16.msra.mxu1 %v3239_v19  ;;  %v3331_v19 = vld [vmem:[%s4432_s5 + $0x2a4] ss:$8 sps:$4 sm:$0xff]  }
 0x19c   :  { %1339 = vmatprep.subr.bf16.mxu1 %v3244_v20  ;;  %v3326_v20 = vld [vmem:[%s4432_s5 + $0xa0] ss:$8 sps:$4 sm:$0xff]  }
 0x19d   :  { %1712 = vmatpush1.bf16.msra.mxu0 %v3308_v7 }
 0x19e   :  { %1713 = vmatprep.subr.bf16.mxu0 %v3316_v9 }
 0x19f   :  { %1340 = vmatpush1.bf16.msra.mxu1 %v3242_v21 }
 0x1a0   :  { %1341 = vmatprep.subr.bf16.mxu1 %v3247_v22 }
 0x1a1   :  { %1714 = vmatpush1.bf16.msra.mxu0 %v3314_v11 }
 0x1a2   :  { %1715 = vmatprep.subr.bf16.mxu0 %v3322_v13  ;;  %v528_v13 = vld [vmem:[%s4431_s4] sm:$0x3] }
 0x1a3   :  { %1342 = vmatpush1.bf16.msra.mxu1 %v3245_v23  ;;  %v3329_v23 = vld [vmem:[%s4432_s5 + $0x2a0] ss:$8 sps:$4 sm:$0xff]  }
 0x1a4   :  { %1343 = vmatprep.subr.bf16.mxu1 %v3250_v24  ;;  %v3334_v24 = vld [vmem:[%s4432_s5 + $0xb4] ss:$8 sps:$4 sm:$0xff]  }
 0x1a5   :  { %1716 = vmatpush1.bf16.msra.mxu0 %v3320_v15 }
 0x1a6   :  { %1717 = vmatprep.subr.bf16.mxu0 %v3328_v18 }
 0x1a7   :  { %1344 = vmatpush1.bf16.msra.mxu1 %v3248_v25 }
 0x1a8   :  { %1345 = vmatprep.subr.bf16.mxu1 %v3253_v26 }
 0x1a9   :  { %1718 = vmatpush1.bf16.msra.mxu0 %v3326_v20 }
 0x1aa   :  { %1719 = vmatprep.subr.bf16.mxu0 %v3334_v24 }
 0x1ab   :  { %1346 = vmatpush1.bf16.msra.mxu1 %v3251_v27  ;;  %v3337_v27 = vld [vmem:[%s4432_s5 + $0x2b4] ss:$8 sps:$4 sm:$0xff]  }
 0x1ac   :  { %1347 = vmatprep.subr.bf16.mxu1 %v3256_v28 }
 0x1af   :  { %1348 = vmatpush1.bf16.msra.mxu1 %v3254_v29 }
 0x1b0   :  { %1349 = vmatprep.subr.bf16.mxu1 %v3259_v30  ;;  %v3332_v30 = vld [vmem:[%s4432_s5 + $0xb0] ss:$8 sps:$4 sm:$0xff]  }
 0x1b1   :  { %1720 = vmatpush1.bf16.msra.mxu0 %v3332_v30 }
 0x1b3   :  { %1350 = vmatpush1.bf16.msra.mxu1 %v3257_v31 }
 0x1b4   :  { %1351 = vmatprep.subr.bf16.mxu1 %v3262_v33 }
 0x1b7   :  { %1352 = vmatpush1.bf16.msra.mxu1 %v3260_v34 }
 0x1b8   :  { %1353 = vmatprep.subr.bf16.mxu1 %v3265_v35 }
 0x1bb   :  { %1354 = vmatpush1.bf16.msra.mxu1 %v3263_v36 }
 0x1bc   :  { %1976 = vmatprep.subr.bf16.mxu1 %v3271_v41 }
 0x1be   :  { %1356 = vmatmul.mubr.bf16.vlgmr.msra.gmra.mrb[16].mxu1 %v3831_v53  ;;  %v3287_v53 = vld [vmem:[%s4432_s5 + $0x230] ss:$8 sps:$4 sm:$0xff]  }
 0x1bf   :  { %1365 = vmatprep.mubr.bf16.mxu1 %v3845_v3  ;;  %1977 = vmatpush1.bf16.msra.mxu1 %v3269_v40  ;;  %v3307_v3 = vld [vmem:[%s4432_s5 + $0x264] ss:$8 sps:$4 sm:$0xff]  }
 0x1c0   :  { %1978 = vmatprep.subr.bf16.mxu1 %v3277_v44  ;;  %v3335_v44 = vld [vmem:[%s4432_s5 + $0x2b0] ss:$8 sps:$4 sm:$0xff]  }
 0x1c3   :  { %1979 = vmatpush1.bf16.msra.mxu1 %v3275_v43 }
 0x1c4   :  { %1980 = vmatprep.subr.bf16.mxu1 %v3283_v48 }
 0x1c6   :  { %1366 = vmatmul.mubr.bf16.gmra.mrb[20].mxu1 %v531_v2  ;;  %v3311_v2 = vld [vmem:[%s4432_s5 + $0x270] ss:$8 sps:$4 sm:$0xff]  }
 0x1c7   :  { %1981 = vmatpush1.bf16.msra.mxu1 %v3281_v50 }
 0x1c8   :  { %1982 = vmatprep.subr.bf16.mxu1 %v3289_v47 }
 0x1cb   :  { %1983 = vmatpush1.bf16.msra.mxu1 %v3287_v53 }
 0x1cc   :  { %1984 = vmatprep.subr.bf16.mxu1 %v3295_v55 }
 0x1cf   :  { %1985 = vmatpush1.bf16.msra.mxu1 %v3293_v58 }
 0x1d0   :  { %1986 = vmatprep.subr.bf16.mxu1 %v3301_v61 }
 0x1d3   :  { %1987 = vmatpush1.bf16.msra.mxu1 %v3299_v0 }
 0x1d4   :  { %1988 = vmatprep.subr.bf16.mxu1 %v3307_v3 }
 0x1d7   :  { %1989 = vmatpush1.bf16.msra.mxu1 %v3305_v5 }
 0x1d8   :  { %1990 = vmatprep.subr.bf16.mxu1 %v3313_v60 }
 0x1db   :  { %1991 = vmatpush1.bf16.msra.mxu1 %v3311_v2 }
 0x1dc   :  { %1992 = vmatprep.subr.bf16.mxu1 %v3319_v10 }
 0x1df   :  { %1993 = vmatpush1.bf16.msra.mxu1 %v3317_v12 }
 0x1e0   :  { %1994 = vmatprep.subr.bf16.mxu1 %v3325_v14 }
 0x1e3   :  { %1995 = vmatpush1.bf16.msra.mxu1 %v3323_v17 }
 0x1e4   :  { %1996 = vmatprep.subr.bf16.mxu1 %v3331_v19 }
 0x1e7   :  { %1997 = vmatpush1.bf16.msra.mxu1 %v3329_v23  ;;  %v3340_v23 = vld [vmem:[%s4432_s5 + $0xc4] ss:$8 sps:$4 sm:$0xff]  }
 0x1e8   :  { %1998 = vmatprep.subr.bf16.mxu1 %v3337_v27  ;;  %v3338_v27 = vld [vmem:[%s4432_s5 + $0xc0] ss:$8 sps:$4 sm:$0xff]   ;;  %1721 = vmatprep.subr.bf16.mxu0 %v3340_v23 }
 0x1e9   :  { %1722 = vmatpush1.bf16.msra.mxu0 %v3338_v27 }
 0x1eb   :  { %1999 = vmatpush1.bf16.msra.mxu1 %v3335_v44  ;;  %v1388_v44 = vrot.slane %v528_v13, %v3735_v63 }
 0x251   :  { %v759_v21 = vpop.f32.mrb[8].mxu1  ;;  %v1038_v22 = vpop.f32.mrb[16].mxu0 }
 0x252   :  { %v761_v25 = vpop.f32.mrb[9].mxu1  ;;  %v1040_v26 = vpop.f32.mrb[17].mxu0  ;;  %v1070_v31 = vrot.slane %v759_v21, 6  ;;  %v1123_v33 = vrot.slane %v1038_v22, 2  ;;  %v4106_v21 = vrot.slane %v528_v13, %v3703_v38 }
 0x253   :  { %v763_v28 = vpop.f32.mrb[10].mxu1  ;;  %v1042_v29 = vpop.f32.mrb[18].mxu0  ;;  %v1071_v39 = vrot.slane %v761_v25, 6  ;;  %v1126_v40 = vrot.slane %v1040_v26, 2 }
 0x254   :  { %v1072_v34 = vrot.slane %v763_v28, 6  ;;  %v1124_v35 = vrot.slane %v1042_v29, 2  ;;  %v765_v36 = vpop.f32.mrb[11].mxu1  ;;  %v1044_v37 = vpop.f32.mrb[19].mxu0  ;;  %v1092_v11 = vsel %vm1069_vm9, 0.0, %v1070_v31 }
 0x255   :  { %v1074_v41 = vrot.slane %v765_v36, 6  ;;  %v1127_v42 = vrot.slane %v1044_v37, 2  ;;  %v1093_v12 = vsel %vm1069_vm9, 0.0, %v1071_v39  ;;  %v1102_v14 = vsel %vm1057_vm10, %v1092_v11, 0.0  ;;  %v3343_v28 = vld [vmem:[%s4432_s5 + $0x2c4] ss:$8 sps:$4 sm:$0xff]  }
 0x256   :  { %v1125_v45 = vsel %vm1122_vm8, %v1123_v33, %v1124_v35  ;;  %v1073_v43 = vsel %vm1069_vm9, %v1070_v31, %v1072_v34  ;;  %v1103_v18 = vsel %vm1057_vm10, %v1093_v12, 0.0  ;;  %v3341_v33 = vld [vmem:[%s4432_s5 + $0x2c0] ss:$8 sps:$4 sm:$0xff]   ;;  %2000 = vmatprep.subr.bf16.mxu1 %v3343_v28 }
 0x257   :  { %v1128_v46 = vsel %vm1122_vm8, %v1126_v40, %v1127_v42  ;;  %v1075_v48 = vsel %vm1069_vm9, %v1071_v39, %v1074_v41  ;;  %2001 = vmatpush1.bf16.msra.mxu1 %v3341_v33  ;;  %v3346_v39 = vld [vmem:[%s4432_s5 + $0xd4] ss:$8 sps:$4 sm:$0xff]   ;;  %v3344_v40 = vld [vmem:[%s4432_s5 + $0xd0] ss:$8 sps:$4 sm:$0xff]  }
 0x258   :  { %1723 = vmatprep.subr.bf16.mxu0 %v3346_v39 }
 0x259   :  { %v769_v49 = vpop.f32.mrb[12].mxu1  ;;  %v1048_v50 = vpop.f32.mrb[20].mxu0  ;;  %1724 = vmatpush1.bf16.msra.mxu0 %v3344_v40 }
 0x25a   :  { %v1076_v51 = vrot.slane %v769_v49, 6  ;;  %v1129_v47 = vrot.slane %v1048_v50, 2  ;;  %v771_v52 = vpop.f32.mrb[13].mxu1  ;;  %v1050_v53 = vpop.f32.mrb[21].mxu0 }
 0x25b   :  { %v1078_v54 = vrot.slane %v771_v52, 6  ;;  %v1131_v55 = vrot.slane %v1050_v53, 2  ;;  %v773_v56 = vpop.f32.mrb[14].mxu1  ;;  %v1052_v58 = vpop.f32.mrb[22].mxu0 }
 0x25c   :  { %v1080_v59 = vrot.slane %v773_v56, 6  ;;  %v1133_v61 = vrot.slane %v1052_v58, 2  ;;  %v775_v62 = vpop.f32.mrb[15].mxu1  ;;  %v1054_v0 = vpop.f32.mrb[23].mxu0  ;;  %v1130_v1 = vsel %vm1122_vm8, %v1124_v35, %v1129_v47  ;;  %v1077_v3 = vsel %vm1069_vm9, %v1072_v34, %v1076_v51  ;;  %v3352_v56 = vld [vmem:[%s4432_s5 + $0xe4] ss:$8 sps:$4 sm:$0xff]  }
 0x25d   :  { %v1082_v4 = vrot.slane %v775_v62, 6  ;;  %v1135_v5 = vrot.slane %v1054_v0, 2  ;;  %v1132_v6 = vsel %vm1122_vm8, %v1127_v42, %v1131_v55  ;;  %v1079_v7 = vsel %vm1069_vm9, %v1074_v41, %v1078_v54  ;;  %v3349_v41 = vld [vmem:[%s4432_s5 + $0x2d4] ss:$8 sps:$4 sm:$0xff]   ;;  %1725 = vmatprep.subr.bf16.mxu0 %v3352_v56 }
 0x25e   :  { %v1134_v60 = vsel %vm1122_vm8, %v1129_v47, %v1133_v61  ;;  %v1081_v9 = vsel %vm1069_vm9, %v1076_v51, %v1080_v59  ;;  %v1157_v30 = vsel %vm1111_vm11, %v1130_v1, 0.0  ;;  %v1158_v35 = vsel %vm1111_vm11, %v1132_v6, 0.0  ;;  %2002 = vmatprep.subr.bf16.mxu1 %v3349_v41  ;;  %v3350_v1 = vld [vmem:[%s4432_s5 + $0xe0] ss:$8 sps:$4 sm:$0xff]  }
 0x25f   :  { %v4092_v2 = vsel %vm1122_vm8, %v1131_v55, %v1135_v5  ;;  %v4096_v10 = vsel %vm1069_vm9, %v1078_v54, %v1082_v4  ;;  %v1145_v42 = vsel %vm1122_vm8, %v1133_v61, 0.0  ;;  %v1107_v50 = vsel %vm1059_vm12, %v1079_v7, 0.0  ;;  %1726 = vmatpush1.bf16.msra.mxu0 %v3350_v1 }
 0x260   :  { %v1146_v47 = vsel %vm1122_vm8, %v1135_v5, 0.0  ;;  %v1161_v61 = vsel %vm1113_vm13, %v1145_v42, 0.0 }
 0x261   :  { %v1162_v12 = vsel %vm1113_vm13, %v1146_v47, 0.0 }
 0x291   :  { %v1357_v15 = vpop.f32.mrb[16].mxu1 }
 0x292   :  { %v1358_v17 = vadd.f32 %v1357_v15, %v1102_v14  ;;  %v1359_v19 = vpop.f32.mrb[17].mxu1 }
 0x293   :  { %v1360_v20 = vadd.f32 %v1359_v19, %v1103_v18  ;;  %v1361_v22 = vpop.f32.mrb[18].mxu1  ;;  %v3356_v18 = vld [vmem:[%s4432_s5 + $0xf0] ss:$8 sps:$4 sm:$0xff]   ;;  %v3361_v19 = vld [vmem:[%s4432_s5 + $0x2f4] ss:$8 sps:$4 sm:$0xff]  }
 0x294   :  { %v1376_v24 = vadd.f32 %v1358_v17, %v1125_v45  ;;  %v1362_v25 = vadd.f32 %v1361_v22, %v1073_v43  ;;  %v1363_v26 = vpop.f32.mrb[19].mxu1  ;;  %v1106_v43 = vsel %vm1059_vm12, %v1077_v3, 0.0  ;;  %v3355_v3 = vld [vmem:[%s4432_s5 + $0x2e4] ss:$8 sps:$4 sm:$0xff]  }
 0x295   :  { %v1377_v29 = vadd.f32 %v1360_v20, %v1128_v46  ;;  %v1364_v31 = vadd.f32 %v1363_v26, %v1075_v48  ;;  %v3347_v48 = vld [vmem:[%s4432_s5 + $0x2d0] ss:$8 sps:$4 sm:$0xff]  }
 0x296   :  { %v1378_v34 = vadd.f32 %v1362_v25, %v1157_v30  ;;  %2003 = vmatpush1.bf16.msra.mxu1 %v3347_v48  ;;  %v1395_v4 = vadd.f32 %v1388_v44, %v1376_v24  ;;  %v3359_v24 = vld [vmem:[%s4432_s5 + $0x2f0] ss:$8 sps:$4 sm:$0xff]  }
 0x297   :  { %v4126_v36 = vadd.f32 %v4106_v21, %v1377_v29  ;;  %v1379_v37 = vadd.f32 %v1364_v31, %v1158_v35  ;;  %2004 = vmatprep.subr.bf16.mxu1 %v3355_v3  ;;  %v3364_v29 = vld [vmem:[%s4432_s5 + $0x104] ss:$8 sps:$4 sm:$0xff]  }
 0x298   :  { %v4156_v58 = vadd.f32 %v1388_v44, %v1378_v34  ;;  %v1403_v20 = vmax.f32 %v1395_v4, 0.0 }
 0x299   :  { %v4141_v45 = vadd.f32 %v4106_v21, %v1379_v37  ;;  %v1367_v46 = vpop.f32.mrb[20].mxu1  ;;  %v1404_v52 = vmax.f32 %v4126_v36, 0.0 }
 0x29a   :  { %v1368_v49 = vadd.f32 %v1367_v46, %v1106_v43  ;;  %v1369_v51 = vpop.f32.mrb[21].mxu1 }
 0x29b   :  { %v1406_v53 = vmax.f32 %v4141_v45, 0.0  ;;  %v1370_v54 = vadd.f32 %v1369_v51, %v1107_v50  ;;  %v1371_v55 = vpop.f32.mrb[22].mxu1 }
 0x29c   :  { %v1380_v59 = vadd.f32 %v1368_v49, %v1134_v60  ;;  %v1372_v62 = vadd.f32 %v1371_v55, %v1081_v9  ;;  %v1373_v0 = vpop.f32.mrb[23].mxu1  ;;  %v3353_v60 = vld [vmem:[%s4432_s5 + $0x2e0] ss:$8 sps:$4 sm:$0xff]  }
 0x29d   :  { %v1381_v5 = vadd.f32 %v1370_v54, %v4092_v2  ;;  %v1374_v6 = vadd.f32 %v1373_v0, %v4096_v10  ;;  %v3093_v7 = vpack.i.bf16 %v1406_v53, %v1404_v52  ;;  %2005 = vmatpush1.bf16.msra.mxu1 %v3353_v60  ;;  %v3358_v2 = vld [vmem:[%s4432_s5 + $0xf4] ss:$8 sps:$4 sm:$0xff]   ;;  %v1405_v10 = vmax.f32 %v4156_v58, 0.0 }
 0x29e   :  { %v1399_v9 = vadd.f32 %v1388_v44, %v1380_v59  ;;  %v1382_v11 = vadd.f32 %v1372_v62, %v1161_v61  ;;  %1727 = vmatprep.subr.bf16.mxu0 %v3358_v2  ;;  %2006 = vmatprep.subr.bf16.mxu1 %v3361_v19  ;;  %v3362_v19 = vld [vmem:[%s4432_s5 + $0x100] ss:$8 sps:$4 sm:$0xff]  }
 0x29f   :  { %v1400_v13 = vadd.f32 %v4106_v21, %v1381_v5  ;;  %v1383_v14 = vadd.f32 %v1374_v6, %v1162_v12  ;;  %3094 = vrot.lane.b32.xlu0 %v3093_v7, %s3454_s30  ;;  %1728 = vmatpush1.bf16.msra.mxu0 %v3356_v18 }
 0x2a0   :  { %v1407_v15 = vmax.f32 %v1399_v9, 0.0  ;;  %v1401_v17 = vadd.f32 %v1388_v44, %v1382_v11  ;;  %2294 = vmatprep.subr.bf16.mxu0 %v3364_v29  ;;  %v3370_v29 = vld [vmem:[%s4432_s5 + $0x124] ss:$8 sps:$4 sm:$0xff]  }
 0x2a1   :  { %v1408_v22 = vmax.f32 %v1400_v13, 0.0  ;;  %v1402_v23 = vadd.f32 %v4106_v21, %v1383_v14  ;;  %2007 = vmatpush1.bf16.msra.mxu1 %v3359_v24  ;;  %v3367_v24 = vld [vmem:[%s4432_s5 + $0x114] ss:$8 sps:$4 sm:$0xff]  }
 0x2a2   :  { %v3103_v25 = vpack.i.bf16 %v1407_v15, %v1405_v10  ;;  %v1409_v26 = vmax.f32 %v1401_v17, 0.0 }
 0x2a3   :  { %v1410_v27 = vmax.f32 %v1402_v23, 0.0  ;;  %v3098_v28 = vpack.i.bf16 %v1403_v20, %v1408_v22 }
 0x2a4   :  { %3104 = vrot.lane.b32.xlu0 %v3103_v25, %s3454_s30 }
 0x2a5   :  { %3099 = vrot.lane.b32.xlu1 %v3098_v28, %s3454_s30  ;;  %v3108_v21 = vpack.i.bf16 %v1409_v26, %v1410_v27  ;;  %v3365_v28 = vld [vmem:[%s4432_s5 + $0x110] ss:$8 sps:$4 sm:$0xff]  }
 0x2a9   :  { %3109 = vrot.lane.b32.xlu1 %v3108_v21, %s3454_s30 }
 0x311   :  { %v3095_v30 = vpop.permute.xlu0 %3094 }
 0x312   :  { %v3097_v31 = vunpack.i.h.bf16 %v3095_v30  ;;  %v3096_v33 = vunpack.i.l.bf16 %v3095_v30 }
 0x314   :  { %v1449_v34 = vsel %vm1435_vm14, %v3097_v31, 0.0  ;;  %v1448_v35 = vsel %vm1435_vm14, %v3096_v33, 0.0 }
 0x315   :  { %v1455_v36 = vmax.f32 %v1406_v53, %v1449_v34  ;;  %v1453_v37 = vmax.f32 %v1404_v52, %v1448_v35  ;;  %v3373_v34 = vld [vmem:[%s4432_s5 + $0x134] ss:$8 sps:$4 sm:$0xff]   ;;  %v3371_v35 = vld [vmem:[%s4432_s5 + $0x130] ss:$8 sps:$4 sm:$0xff]  }
 0x316   :  { %v3105_v39 = vpop.permute.xlu0 %3104 }
 0x317   :  { %v3107_v40 = vunpack.i.h.bf16 %v3105_v39  ;;  %v3106_v41 = vunpack.i.l.bf16 %v3105_v39  ;;  %v3100_v42 = vpop.permute.xlu1 %3099  ;;  %v1472_v43 = vrot.slane %v1455_v36, 2  ;;  %v1471_v46 = vrot.slane %v1453_v37, 2  ;;  %v3379_v39 = vld [vmem:[%s4432_s5 + $0x154] ss:$8 sps:$4 sm:$0xff]  }
 0x318   :  { %v3102_v44 = vunpack.i.h.bf16 %v3100_v42  ;;  %v3101_v45 = vunpack.i.l.bf16 %v3100_v42  ;;  %v3380_v42 = vld [vmem:[%s4432_s5 + $0x160] ss:$8 sps:$4 sm:$0xff]  }
 0x319   :  { %v1437_v48 = vsel %vm1435_vm14, %v3106_v41, %v3097_v31  ;;  %v1473_v4 = vsel %vm1122_vm8, %v1471_v46, %v1472_v43  ;;  %v3368_v31 = vld [vmem:[%s4432_s5 + $0x120] ss:$8 sps:$4 sm:$0xff]   ;;  %v3382_v41 = vld [vmem:[%s4432_s5 + $0x164] ss:$8 sps:$4 sm:$0xff]  }
 0x31a   :  { %v1454_v49 = vmax.f32 %v1405_v10, %v1437_v48  ;;  %v1436_v50 = vsel %vm1435_vm14, %v3102_v44, %v3096_v33  ;;  %v1438_v51 = vsel %vm1435_vm14, %v3107_v40, %v3101_v45  ;;  %v1450_v47 = vsel %vm1435_vm14, %v3101_v45, 0.0  ;;  %v3377_v40 = vld [vmem:[%s4432_s5 + $0x150] ss:$8 sps:$4 sm:$0xff]   ;;  %v3385_v44 = vld [vmem:[%s4432_s5 + $0x174] ss:$8 sps:$4 sm:$0xff]  }
 0x31b   :  { %v1452_v54 = vmax.f32 %v1403_v20, %v1436_v50  ;;  %v1456_v53 = vmax.f32 %v1407_v15, %v1438_v51  ;;  %v1457_v52 = vmax.f32 %v1408_v22, %v1450_v47  ;;  %v3110_v55 = vpop.permute.xlu1 %3109  ;;  %v1493_v2 = vmax.f32 %v1453_v37, %v1473_v4  ;;  %v3374_v37 = vld [vmem:[%s4432_s5 + $0x140] ss:$8 sps:$4 sm:$0xff]   ;;  %v3383_v45 = vld [vmem:[%s4432_s5 + $0x170] ss:$8 sps:$4 sm:$0xff]   ;;  %v3391_v48 = vld [vmem:[%s4432_s5 + $0x194] ss:$8 sps:$4 sm:$0xff]  }
 0x31c   :  { %v1469_v56 = vrot.slane %v1454_v49, 2  ;;  %v3112_v58 = vunpack.i.h.bf16 %v3110_v55  ;;  %v3111_v59 = vunpack.i.l.bf16 %v3110_v55  ;;  %v3386_v46 = vld [vmem:[%s4432_s5 + $0x180] ss:$8 sps:$4 sm:$0xff]   ;;  %v3394_v50 = vld [vmem:[%s4432_s5 + $0x1a4] ss:$8 sps:$4 sm:$0xff]  }
 0x31d   :  { %v1468_v61 = vrot.slane %v1452_v54, 2  ;;  %v1474_v62 = vrot.slane %v1456_v53, 2  ;;  %v1476_v0 = vrot.slane %v1457_v52, 2  ;;  %v3392_v51 = vld [vmem:[%s4432_s5 + $0x1a0] ss:$8 sps:$4 sm:$0xff]  }
 0x31e   :  { %v1439_v1 = vsel %vm1435_vm14, %v3112_v58, %v3111_v59  ;;  %v1451_v3 = vsel %vm1435_vm14, %v3111_v59, 0.0  ;;  %v3397_v47 = vld [vmem:[%s4432_s5 + $0x1b4] ss:$8 sps:$4 sm:$0xff]   ;;  %v3406_v58 = vld [vmem:[%s4432_s5 + $0x1e4] ss:$8 sps:$4 sm:$0xff]  }
 0x31f   :  { %v1470_v5 = vsel %vm1122_vm8, %v1468_v61, %v1469_v56  ;;  %v1475_v6 = vsel %vm1122_vm8, %v1469_v56, %v1474_v62  ;;  %v1458_v7 = vmax.f32 %v1409_v26, %v1439_v1  ;;  %v1459_v60 = vmax.f32 %v1410_v27, %v1451_v3  ;;  %v3403_v55 = vld [vmem:[%s4432_s5 + $0x1d4] ss:$8 sps:$4 sm:$0xff]   ;;  %v3401_v56 = vld [vmem:[%s4432_s5 + $0x1d0] ss:$8 sps:$4 sm:$0xff]   ;;  %v3404_v59 = vld [vmem:[%s4432_s5 + $0x1e0] ss:$8 sps:$4 sm:$0xff]  }
 0x320   :  { %v1492_v9 = vmax.f32 %v1452_v54, %v1470_v5  ;;  %v1494_v11 = vmax.f32 %v1454_v49, %v1475_v6  ;;  %v1477_v12 = vsel %vm1122_vm8, %v1472_v43, %v1476_v0  ;;  %v3388_v43 = vld [vmem:[%s4432_s5 + $0x184] ss:$8 sps:$4 sm:$0xff]   ;;  %v3389_v49 = vld [vmem:[%s4432_s5 + $0x190] ss:$8 sps:$4 sm:$0xff]   ;;  %v3409_v61 = vld [vmem:[%s4432_s5 + $0x1f4] ss:$8 sps:$4 sm:$0xff]  }
 0x321   :  { %v1478_v13 = vrot.slane %v1458_v7, 2  ;;  %v1480_v14 = vrot.slane %v1459_v60, 2  ;;  %v1495_v10 = vmax.f32 %v1455_v36, %v1477_v12  ;;  %v3376_v36 = vld [vmem:[%s4432_s5 + $0x144] ss:$8 sps:$4 sm:$0xff]   ;;  %v3395_v54 = vld [vmem:[%s4432_s5 + $0x1b0] ss:$8 sps:$4 sm:$0xff]  }
 0x322   :  { %v4203_v15 = vpack.c.bf16 %v1494_v11, %v1492_v9  ;;  %v3411_v1 = vld [vmem:[%s4434_s7] sm:$0xff]   ;;  %v3412_v3 = vld [vmem:[%s4434_s7 + $0x48] sm:$0xff]   ;;  %v3414_v5 = vld [vmem:[%s4434_s7 + $0x50] sm:$0xff]  }
 0x323   :  { %v1491_v17 = vsel %vm1122_vm8, %v1480_v14, 0.0  ;;  %v1502_v18 = vpack.c.bf16 %v1495_v10, %v1493_v2  ;;  %v1481_v20 = vsel %vm1122_vm8, %v1476_v0, %v1480_v14  ;;  %v1479_v25 = vsel %vm1122_vm8, %v1474_v62, %v1478_v13  ;;  %v3407_v62 = vld [vmem:[%s4432_s5 + $0x1f0] ss:$8 sps:$4 sm:$0xff]   ;;  %v3410_v0 = vld [vmem:[%s4434_s7 + $0x40] sm:$0xff]   ;;  %v3413_v4 = vld [vmem:[%s4434_s7 + $0x8] sm:$0xff]  }
 0x324   :  { %v1499_v22 = vmax.f32 %v1459_v60, %v1491_v17  ;;  %v1497_v23 = vmax.f32 %v1457_v52, %v1481_v20  ;;  %v1490_v26 = vsel %vm1122_vm8, %v1478_v13, 0.0  ;;  %v1496_v21 = vmax.f32 %v1456_v53, %v1479_v25  ;;  %v3400_v53 = vld [vmem:[%s4432_s5 + $0x1c4] ss:$8 sps:$4 sm:$0xff]   ;;  %v3398_v52 = vld [vmem:[%s4432_s5 + $0x1c0] ss:$8 sps:$4 sm:$0xff]   ;;  %3047 = vmatprep.subr.bf16.mxu1 %v3410_v0  ;;  %v3415_v6 = vld [vmem:[%s4434_s7 + $0x10] sm:$0xff]  }
 0x325   :  { %1729 = vmatprep.mubr.bf16.mxu0 %v1502_v18  ;;  %2008 = vmatprep.mubr.bf16.mxu1 %v1502_v18  ;;  %v1498_v30 = vmax.f32 %v1458_v7, %v1490_v26  ;;  %v3416_v7 = vld [vmem:[%s4434_s7 + $0x58] sm:$0xff]   ;;  %v3418_v9 = vld [vmem:[%s4434_s7 + $0x60] sm:$0xff]   ;;  %v3420_v12 = vld [vmem:[%s4434_s7 + $0x68] sm:$0xff]   ;;  %vm2529_vm8 = vcmask 1041409  }
 0x326   :  { %1730 = vmatmul.mubr.bf16.vlgmr.msra.gmra.mrb[24].mxu0 %v4203_v15  ;;  %2009 = vmatmul.mubr.bf16.vlgmr.msra.gmra.mrb[24].mxu1 %v4203_v15  ;;  %v4217_v27 = vpack.c.bf16 %v1499_v22, %v1497_v23  ;;  %v3417_v60 = vld [vmem:[%s4434_s7 + $0x18] sm:$0xff]   ;;  %v3419_v11 = vld [vmem:[%s4434_s7 + $0x20] sm:$0xff]   ;;  %v3421_v13 = vld [vmem:[%s4434_s7 + $0x28] sm:$0xff]  }
 0x327   :  { %2295 = vmatpush1.bf16.msra.mxu0 %v3362_v19  ;;  %v1503_v33 = vpack.c.bf16 %v1498_v30, %v1496_v21  ;;  %3048 = vmatpush3.bf16.msra.mxu1 %v3411_v1  ;;  %v3422_v14 = vld [vmem:[%s4434_s7 + $0x70] sm:$0xff]   ;;  %v3424_v10 = vld [vmem:[%s4434_s7 + $0x78] sm:$0xff]  }
 0x328   :  { %1739 = vmatprep.mubr.bf16.mxu0 %v4217_v27  ;;  %2018 = vmatprep.mubr.bf16.mxu1 %v4217_v27  ;;  %v3423_v2 = vld [vmem:[%s4434_s7 + $0x30] sm:$0xff]  }
 0x329   :  { %2296 = vmatprep.subr.bf16.mxu0 %v3367_v24  ;;  %3049 = vmatprep.subr.bf16.mxu1 %v3412_v3 }
 0x32b   :  { %2297 = vmatpush1.bf16.msra.mxu0 %v3365_v28  ;;  %3050 = vmatpush3.bf16.msra.mxu1 %v3413_v4  ;;  %v1500_v4 = vld [vmem:[%s4433_s6] sm:$0x3] }
 0x32c   :  { %2298 = vmatprep.subr.bf16.mxu0 %v3370_v29  ;;  %3051 = vmatprep.subr.bf16.mxu1 %v3414_v5 }
 0x32e   :  { %1740 = vmatmul.mubr.bf16.gmra.mrb[28].mxu0 %v1503_v33  ;;  %2019 = vmatmul.mubr.bf16.gmra.mrb[28].mxu1 %v1503_v33 }
 0x32f   :  { %2299 = vmatpush1.bf16.msra.mxu0 %v3368_v31  ;;  %2326 = vmatprep.mubr.bf16.mxu0 %v1502_v18 }
 0x330   :  { %2300 = vmatprep.subr.bf16.mxu0 %v3373_v34  ;;  %3052 = vmatpush3.bf16.msra.mxu1 %v3415_v6 }
 0x331   :  { %3053 = vmatprep.subr.bf16.mxu1 %v3416_v7 }
 0x333   :  { %2301 = vmatpush1.bf16.msra.mxu0 %v3371_v35 }
 0x334   :  { %2302 = vmatprep.subr.bf16.mxu0 %v3376_v36  ;;  %3054 = vmatpush3.bf16.msra.mxu1 %v3417_v60 }
 0x335   :  { %3055 = vmatprep.subr.bf16.mxu1 %v3418_v9  ;;  %v2359_v9 = vrot.slane %v1500_v4, %v3735_v63 }
 0x337   :  { %2303 = vmatpush1.bf16.msra.mxu0 %v3374_v37 }
 0x338   :  { %2304 = vmatprep.subr.bf16.mxu0 %v3379_v39  ;;  %3056 = vmatpush3.bf16.msra.mxu1 %v3419_v11 }
 0x339   :  { %3057 = vmatprep.subr.bf16.mxu1 %v3420_v12 }
 0x33b   :  { %2305 = vmatpush1.bf16.msra.mxu0 %v3377_v40 }
 0x33c   :  { %2306 = vmatprep.subr.bf16.mxu0 %v3382_v41  ;;  %3058 = vmatpush3.bf16.msra.mxu1 %v3421_v13  ;;  %v2386_v13 = vand.u32 3, %v3690_v16 }
 0x33d   :  { %3059 = vmatprep.subr.bf16.mxu1 %v3422_v14 }
 0x33e   :  { %vm4383_vm4 = vcmp.eq.s32.totalorder %v2386_v13, 0 }
 0x33f   :  { %2307 = vmatpush1.bf16.msra.mxu0 %v3380_v42 }
 0x340   :  { %2308 = vmatprep.subr.bf16.mxu0 %v3385_v44  ;;  %3060 = vmatpush3.bf16.msra.mxu1 %v3423_v2  ;;  %v2363_v2 = vrot.slane %v1500_v4, %v3703_v38 }
 0x341   :  { %3061 = vmatprep.subr.bf16.mxu1 %v3424_v10 }
 0x343   :  { %2309 = vmatpush1.bf16.msra.mxu0 %v3383_v45 }
 0x344   :  { %2310 = vmatprep.subr.bf16.mxu0 %v3388_v43 }
 0x347   :  { %2311 = vmatpush1.bf16.msra.mxu0 %v3386_v46 }
 0x348   :  { %2312 = vmatprep.subr.bf16.mxu0 %v3391_v48 }
 0x34b   :  { %2313 = vmatpush1.bf16.msra.mxu0 %v3389_v49 }
 0x34c   :  { %2314 = vmatprep.subr.bf16.mxu0 %v3394_v50 }
 0x34f   :  { %2315 = vmatpush1.bf16.msra.mxu0 %v3392_v51 }
 0x350   :  { %2316 = vmatprep.subr.bf16.mxu0 %v3397_v47 }
 0x353   :  { %2317 = vmatpush1.bf16.msra.mxu0 %v3395_v54 }
 0x354   :  { %2318 = vmatprep.subr.bf16.mxu0 %v3400_v53 }
 0x357   :  { %2319 = vmatpush1.bf16.msra.mxu0 %v3398_v52 }
 0x358   :  { %2320 = vmatprep.subr.bf16.mxu0 %v3403_v55 }
 0x35b   :  { %2321 = vmatpush1.bf16.msra.mxu0 %v3401_v56 }
 0x35c   :  { %2322 = vmatprep.subr.bf16.mxu0 %v3406_v58 }
 0x35f   :  { %2323 = vmatpush1.bf16.msra.mxu0 %v3404_v59 }
 0x360   :  { %2324 = vmatprep.subr.bf16.mxu0 %v3409_v61 }
 0x363   :  { %2325 = vmatpush1.bf16.msra.mxu0 %v3407_v62 }
 0x366   :  { %2327 = vmatmul.mubr.bf16.vlgmr.msra.gmra.mrb[32].mxu0 %v4203_v15  ;;  %v3425_v15 = vld [vmem:[%s4434_s7 + $0x38] sm:$0xff]  }
 0x367   :  { %2336 = vmatprep.mubr.bf16.mxu0 %v4217_v27  ;;  %3062 = vmatpush3.bf16.msra.mxu1 %v3425_v15  ;;  %v2393_v15 = vand.u32 3, %v3698_v32 }
 0x369   :  { %vm4387_vm5 = vcmp.eq.s32.totalorder %v2393_v15, 0 }
 0x36e   :  { %2337 = vmatmul.mubr.bf16.gmra.mrb[36].mxu0 %v1503_v33 }
 0x3f9   :  { %v1731_v17 = vpop.f32.mrb[24].mxu0  ;;  %v2010_v18 = vpop.f32.mrb[24].mxu1 }
 0x3fa   :  { %v1733_v19 = vpop.f32.mrb[25].mxu0  ;;  %v2012_v20 = vpop.f32.mrb[25].mxu1  ;;  %v2042_v24 = vrot.slane %v1731_v17, 4  ;;  %v2094_v25 = vrot.slane %v2010_v18, 4 }
 0x3fb   :  { %v1735_v22 = vpop.f32.mrb[26].mxu0  ;;  %v2014_v23 = vpop.f32.mrb[26].mxu1  ;;  %v2043_v21 = vrot.slane %v1733_v19, 4  ;;  %v2097_v30 = vrot.slane %v2012_v20, 4 }
 0x3fc   :  { %v2044_v26 = vrot.slane %v1735_v22, 4  ;;  %v2095_v27 = vrot.slane %v2014_v23, 4  ;;  %v1737_v28 = vpop.f32.mrb[27].mxu0  ;;  %v2016_v29 = vpop.f32.mrb[27].mxu1  ;;  %v2064_v3 = vsel %vm2041_vm15, 0.0, %v2042_v24 }
 0x3fd   :  { %v2046_v31 = vrot.slane %v1737_v28, 4  ;;  %v2098_v33 = vrot.slane %v2016_v29, 4  ;;  %v2065_v5 = vsel %vm2041_vm15, 0.0, %v2043_v21  ;;  %v2074_v6 = vsel %vm2029_vm0, %v2064_v3, 0.0 }
 0x3fe   :  { %v2096_v34 = vsel %vm2041_vm15, %v2094_v25, %v2095_v27  ;;  %v2045_v35 = vsel %vm2041_vm15, %v2042_v24, %v2044_v26  ;;  %v2075_v11 = vsel %vm2029_vm0, %v2065_v5, 0.0 }
 0x3ff   :  { %v2099_v36 = vsel %vm2041_vm15, %v2097_v30, %v2098_v33  ;;  %v2047_v37 = vsel %vm2041_vm15, %v2043_v21, %v2046_v31  ;;  %v2400_v21 = vand.u32 3, %v3726_v57 }
 0x401   :  { %v1741_v39 = vpop.f32.mrb[28].mxu0  ;;  %v2020_v40 = vpop.f32.mrb[28].mxu1  ;;  %vm2432_vm6 = vcmp.eq.s32.totalorder %v2400_v21, 0 }
 0x402   :  { %v2048_v41 = vrot.slane %v1741_v39, 4  ;;  %v2100_v42 = vrot.slane %v2020_v40, 4  ;;  %v1743_v44 = vpop.f32.mrb[29].mxu0  ;;  %v2022_v45 = vpop.f32.mrb[29].mxu1 }
 0x403   :  { %v2050_v43 = vrot.slane %v1743_v44, 4  ;;  %v2102_v46 = vrot.slane %v2022_v45, 4  ;;  %v1745_v48 = vpop.f32.mrb[30].mxu0  ;;  %v2024_v49 = vpop.f32.mrb[30].mxu1 }
 0x404   :  { %v2052_v50 = vrot.slane %v1745_v48, 4  ;;  %v2104_v51 = vrot.slane %v2024_v49, 4  ;;  %v1747_v47 = vpop.f32.mrb[31].mxu0  ;;  %v2026_v54 = vpop.f32.mrb[31].mxu1  ;;  %v2101_v53 = vsel %vm2041_vm15, %v2095_v27, %v2100_v42  ;;  %v2049_v52 = vsel %vm2041_vm15, %v2044_v26, %v2048_v41 }
 0x405   :  { %v2054_v55 = vrot.slane %v1747_v47, 4  ;;  %v2106_v56 = vrot.slane %v2026_v54, 4  ;;  %v2103_v58 = vsel %vm2041_vm15, %v2098_v33, %v2102_v46  ;;  %v2051_v61 = vsel %vm2041_vm15, %v2046_v31, %v2050_v43 }
 0x406   :  { %v2105_v59 = vsel %vm2041_vm15, %v2100_v42, %v2104_v51  ;;  %v2053_v0 = vsel %vm2041_vm15, %v2048_v41, %v2052_v50  ;;  %v2128_v22 = vsel %vm2083_vm1, %v2101_v53, 0.0  ;;  %v2129_v25 = vsel %vm2083_vm1, %v2103_v58, 0.0 }
 0x407   :  { %v2107_v62 = vsel %vm2041_vm15, %v2102_v46, %v2106_v56  ;;  %v2055_v1 = vsel %vm2041_vm15, %v2050_v43, %v2054_v55  ;;  %v2116_v27 = vsel %vm2041_vm15, %v2104_v51, 0.0  ;;  %v2078_v33 = vsel %vm2031_vm2, %v2049_v52, 0.0 }
 0x408   :  { %v2079_v40 = vsel %vm2031_vm2, %v2051_v61, 0.0  ;;  %v2132_v43 = vsel %vm2085_vm3, %v2116_v27, 0.0 }
 0x439   :  { %v2328_v7 = vpop.f32.mrb[32].mxu0 }
 0x43a   :  { %v2329_v60 = vadd.f32 %v2328_v7, %v2074_v6  ;;  %v2330_v12 = vpop.f32.mrb[33].mxu0 }
 0x43b   :  { %v2331_v14 = vadd.f32 %v2330_v12, %v2075_v11  ;;  %v2332_v10 = vpop.f32.mrb[34].mxu0 }
 0x43c   :  { %v2347_v17 = vadd.f32 %v2329_v60, %v2096_v34  ;;  %v2333_v18 = vadd.f32 %v2332_v10, %v2045_v35  ;;  %v2334_v19 = vpop.f32.mrb[35].mxu0  ;;  %v2407_v35 = vand.u32 3, %v3745_v8 }
 0x43d   :  { %v2348_v20 = vadd.f32 %v2331_v14, %v2099_v36  ;;  %v2335_v23 = vadd.f32 %v2334_v19, %v2047_v37  ;;  %v2117_v36 = vsel %vm2041_vm15, %v2106_v56, 0.0 }
 0x43e   :  { %v2366_v63 = vadd.f32 %v2359_v9, %v2347_v17  ;;  %v2349_v24 = vadd.f32 %v2333_v18, %v2128_v22  ;;  %v2133_v61 = vsel %vm2085_vm3, %v2117_v36, 0.0  ;;  %vm2433_vm7 = vcmp.eq.s32.totalorder %v2407_v35, 0 }
 0x43f   :  { %v2367_v38 = vadd.f32 %v2363_v2, %v2348_v20  ;;  %v2350_v26 = vadd.f32 %v2335_v23, %v2129_v25 }
 0x440   :  { %v2374_v28 = vmax.f32 %v2366_v63, 0.0  ;;  %v2368_v29 = vadd.f32 %v2359_v9, %v2349_v24 }
 0x441   :  { %v2375_v30 = vmax.f32 %v2367_v38, 0.0  ;;  %v2369_v31 = vadd.f32 %v2363_v2, %v2350_v26  ;;  %v2338_v34 = vpop.f32.mrb[36].mxu0 }
 0x442   :  { %v2376_v37 = vmax.f32 %v2368_v29, 0.0  ;;  %v2339_v39 = vadd.f32 %v2338_v34, %v2078_v33  ;;  %v2340_v41 = vpop.f32.mrb[37].mxu0  ;;  %v2442_v42 = vsel %vm4383_vm4, %v2374_v28, 0.0 }
 0x443   :  { %v2377_v44 = vmax.f32 %v2369_v31, 0.0  ;;  %v2341_v45 = vadd.f32 %v2340_v41, %v2079_v40  ;;  %v2342_v46 = vpop.f32.mrb[38].mxu0  ;;  %v2443_v48 = vsel %vm4383_vm4, %v2375_v30, 0.0 }
 0x444   :  { %v2444_v49 = vsel %vm4387_vm5, %v2376_v37, 0.0  ;;  %v2351_v50 = vadd.f32 %v2339_v39, %v2105_v59  ;;  %v2343_v51 = vadd.f32 %v2342_v46, %v2053_v0  ;;  %v2344_v57 = vpop.f32.mrb[39].mxu0 }
 0x445   :  { %v2450_v47 = vadd.f32 %v2444_v49, %v2442_v42  ;;  %v2445_v54 = vsel %vm4387_vm5, %v2377_v44, 0.0  ;;  %v2352_v53 = vadd.f32 %v2341_v45, %v2107_v62  ;;  %v2345_v52 = vadd.f32 %v2344_v57, %v2055_v1 }
 0x446   :  { %v2457_v55 = vadd.f32 %v2445_v54, %v2443_v48  ;;  %v2370_v56 = vadd.f32 %v2359_v9, %v2351_v50  ;;  %v2353_v58 = vadd.f32 %v2343_v51, %v2132_v43  ;;  %v3030_v48 = vld [vmem:[%s4435_s8] ss:$0 sm:$0xff] }
 0x447   :  { %v2451_v3 = vrot.slane %v2450_v47, 4  ;;  %v2371_v4 = vadd.f32 %v2363_v2, %v2352_v53  ;;  %v2354_v5 = vadd.f32 %v2345_v52, %v2133_v61 }
 0x448   :  { %v2458_v6 = vrot.slane %v2457_v55, 4  ;;  %v2378_v7 = vmax.f32 %v2370_v56, 0.0  ;;  %v2372_v59 = vadd.f32 %v2359_v9, %v2353_v58 }
 0x449   :  { %v2452_v0 = vadd.f32 %v2451_v3, %v2450_v47  ;;  %v2379_v60 = vmax.f32 %v2371_v4, 0.0  ;;  %v2373_v11 = vadd.f32 %v2363_v2, %v2354_v5 }
 0x44a   :  { %v2459_v12 = vadd.f32 %v2458_v6, %v2457_v55  ;;  %v2380_v62 = vmax.f32 %v2372_v59, 0.0  ;;  %v2446_v10 = vsel %vm2432_vm6, %v2378_v7, 0.0 }
 0x44b   :  { %v2453_v1 = vrot.slane %v2452_v0, 2  ;;  %v2381_v13 = vmax.f32 %v2373_v11, 0.0  ;;  %v2447_v17 = vsel %vm2432_vm6, %v2379_v60, 0.0 }
 0x44c   :  { %v2460_v14 = vrot.slane %v2459_v12, 2  ;;  %v2448_v15 = vsel %vm2433_vm7, %v2380_v62, 0.0 }
 0x44d   :  { %v2454_v8 = vadd.f32 %v2453_v1, %v2452_v0  ;;  %v2464_v18 = vadd.f32 %v2448_v15, %v2446_v10  ;;  %v2449_v19 = vsel %vm2433_vm7, %v2381_v13, 0.0 }
 0x44e   :  { %v2471_v20 = vadd.f32 %v2449_v19, %v2447_v17  ;;  %v2461_v22 = vadd.f32 %v2460_v14, %v2459_v12 }
 0x44f   :  { %v2465_v23 = vrot.slane %v2464_v18, 4  ;;  %v2455_v9 = vrot.slane %v2454_v8, 1 }
 0x450   :  { %v2472_v63 = vrot.slane %v2471_v20, 4  ;;  %v2462_v16 = vrot.slane %v2461_v22, 1 }
 0x451   :  { %v2466_v24 = vadd.f32 %v2465_v23, %v2464_v18  ;;  %v2456_v32 = vadd.f32 %v2455_v9, %v2454_v8 }
 0x452   :  { %v2473_v25 = vadd.f32 %v2472_v63, %v2471_v20  ;;  %v2463_v27 = vadd.f32 %v2462_v16, %v2461_v22 }
 0x453   :  { %v2467_v2 = vrot.slane %v2466_v24, 2  ;;  %v2478_v31 = vpack.c.bf16 %v2456_v32, %v2456_v32 }
 0x454   :  { %v2474_v38 = vrot.slane %v2473_v25, 2  ;;  %v2479_v34 = vpack.c.bf16 %v2463_v27, %v2463_v27 }
 0x455   :  { %v2468_v26 = vadd.f32 %v2467_v2, %v2466_v24  ;;  %v2525_v37 = vunpack.c.l.b16 %v2478_v31 }
 0x456   :  { %v2475_v28 = vadd.f32 %v2474_v38, %v2473_v25  ;;  %v2526_v40 = vunpack.c.l.b16 %v2479_v34 }
 0x457   :  { %v2469_v29 = vrot.slane %v2468_v26, 1 }
 0x458   :  { %v2476_v21 = vrot.slane %v2475_v28, 1 }
 0x459   :  { %v2470_v30 = vadd.f32 %v2469_v29, %v2468_v26 }
 0x45a   :  { %v2477_v33 = vadd.f32 %v2476_v21, %v2475_v28 }
 0x45b   :  { %v2480_v35 = vpack.c.bf16 %v2470_v30, %v2470_v30 }
 0x45c   :  { %v2481_v36 = vpack.c.bf16 %v2477_v33, %v2477_v33 }
 0x45d   :  { %v2527_v39 = vunpack.c.l.b16 %v2480_v35 }
 0x45e   :  { %v2528_v41 = vunpack.c.l.b16 %v2481_v36 }
 0x45f   :  { %v2530_v42 = vsel %vm2529_vm8, %v2527_v39, %v2525_v37 }
 0x460   :  { %v2531_v44 = vsel %vm2529_vm8, %v2528_v41, %v2526_v40  ;;  %v2532_v43 = vpack.c.b16 %v2530_v42, %v2530_v42 }
 0x461   :  { %v2533_v45 = vpack.c.b16 %v2531_v44, %v2531_v44 }
 0x463   :  { %2664 = vmatprep.mubr.bf16.mxu1 %v2533_v45 }
 0x464   :  { %2665 = vmatmul.mubr.bf16.vlgmr.msra.gmra.mrb[32].mxu1 %v2532_v43 }
 0x537   :  { %v3063_v46 = vpop.f32.mrb[32].mxu1 }
 0x538   :  { %v3064_v49 = vpop.f32.mrb[33].mxu1 }
 0x539   :  { %v3065_v50 = vadd.f32 %v3064_v49, %v3063_v46  ;;  %v3066_v51 = vpop.f32.mrb[34].mxu1 }
 0x53a   :  { %v3067_v57 = vpop.f32.mrb[35].mxu1 }
 0x53b   :  { %v2667_v47 = vadd.f32 %v3065_v50, %v3030_v48 }
 0x53d   :  { %v2672_v54 = vmul.f32 %v2667_v47, %v2667_v47 }
 0x53f   :  { %v2673_v53 = vsel %vm1069_vm9, %v2672_v54, 0.0 }
 0x540   :  { %2674 = vadd.xlane.f32.xlu0 %v2673_v53 }
 0x5cd   :  { %v2675_v52 = vpop.xlane.xlu0 %2674 }
 0x5ce   :  { %v2676_v55 = vmax.f32 %v2675_v52, 1e-24 }
 0x5d0   :  { %3426 = vrsqrt.f32 %v2676_v55 }
 0x5da   :  { %v3427_v56 = vpop.eup %3426 }
 0x5db   :  { %v2678_v58 = vmul.f32 %v3427_v56, %v2667_v47 }
 0x5dd   :  { %2679 = vst [vmem:[#allocation2] sm:$0x3] %v2678_v58 }
 0x5de   :  { %3439 = shalt.err (!%p3436_p4)
}
 0x5df   :  { %s3440_s12 = scalar_lea.hbm %s4436_s9, 32 }
 0x5e0   :  { %p3441_p5 = scmp.ne.s32.totalorder %s4436_s9, %s3440_s12  ;;  %p3444_p6 = scmp.lt.u32.totalorder %s3440_s12, %s4436_s9 }
 0x5e2   :  { %p3446_p7 = pnand %p3444_p6, %p3441_p5 }
 0x5e4   :  { %3449 = shalt.err (!%p3446_p7)
}
 0x5e5   :  { %2689 = dma.vmem_to_hbm [thread:$0]  %s2687_s11, 32, %s4436_s9, [#allocation3]  }
 0x5e6   :  { %3450 = dma.done.wait [#allocation3], 32  }
 0x5e7   :  { %3451 = vsyncadd [#allocation3], 4294967264 }
 0x5e8   :  { %2693 = vsyncpa [#allocation3], 1 }

</bundles_post_ra>
